<compile_context>
chip_gen: v7x
topology: tpu7x:2x2x1
jax: 0.10.0
libtpu: 0.0.40
codegen_flags: <defaults>
</compile_context>

<pallas_src>
import functools
import jax
import jax.numpy as jnp
from jax.experimental import pallas as pl
from jax.experimental.pallas import tpu as pltpu

# ----------------------------- config (small) -----------------------------
B = 2          # batch
S = 8          # sequence length
D = 32         # hidden size
H = 4          # attention heads
DH = D // H    # head dim
L = 2          # encoder layers
FF = 64        # intermediate (FFN) size
V = 64         # vocab size
MAXPOS = 16    # position-embedding table size
LN_EPS = 1e-5  # RoBERTa layer_norm_eps
ATT_SCALE = 1.0 / (DH ** 0.5)


# --------------------------- in-kernel helpers ------------------------------
def _layernorm(x, g, b):
    mu = jnp.mean(x, axis=-1, keepdims=True)
    d = x - mu
    var = jnp.mean(d * d, axis=-1, keepdims=True)
    return d * jax.lax.rsqrt(var + LN_EPS) * g + b


def _gelu(x):
    # TODO(synk): HF RoBERTa uses exact erf GELU; tanh approximation used here.
    return 0.5 * x * (1.0 + jnp.tanh(0.7978845608028654 * (x + 0.044715 * x * x * x)))


# --------------------------- fused Pallas kernel ----------------------------
def fused_encoder_kernel(pos_col_ref, pos_row_ref, attn_ref, wemb_ref, oemb_ref,
                         emb_g_ref, emb_b_ref,
                         wqkv_ref, bqkv_ref, wo_ref, bo_ref,
                         ln1_g_ref, ln1_b_ref,
                         w1_ref, b1_ref, w2_ref, b2_ref,
                         ln2_g_ref, ln2_b_ref,
                         wp_ref, bp_ref,
                         out_ref):
    """Whole GraphCodeBERT wrapper forward for one batch element (grid=(B,))."""
    pos_c = pos_col_ref[0]                                 # (S, 1) int32
    pos_r = pos_row_ref[0]                                 # (1, S) int32
    attn = attn_ref[0]                                     # (S, S) f32 (0/1)
    emb = wemb_ref[0]                                      # (S, D) f32

    # ---- node -> token aggregation (masks built in-kernel) ----
    nodes = (pos_c == 0).astype(jnp.float32)               # (S, 1)
    tok = (pos_r >= 2).astype(jnp.float32)                 # (1, S)
    m = nodes * tok * attn                                 # (S, S)
    denom = jnp.sum(m, axis=-1, keepdims=True) + 1e-10     # (S, 1)
    mn = m * pl.reciprocal(denom, approx=True)
    avg = jnp.dot(mn, emb, preferred_element_type=jnp.float32)  # (S, D)
    x = emb * (1.0 - nodes) + avg * nodes

    # ---- RoBERTa embeddings LayerNorm (pos + type emb added in glue) ----
    h = _layernorm(x + oemb_ref[0], emb_g_ref[...], emb_b_ref[...])   # (S, D)

    # additive attention mask, resident across all layers
    bias_h = ((1.0 - attn) * (-1e9))[None, :, :]            # (1, S, S)

    # ---- encoder layers (statically unrolled, all weights resident) ----
    for l in range(L):
        wqkv = wqkv_ref[l]                                  # (H, D, 3*DH)
        bqkv = bqkv_ref[l]                                  # (H, 1, 3*DH)

        hH = jnp.broadcast_to(h[None, :, :], (H, S, D))     # (H, S, D)
        qkv = jnp.einsum('hsd,hdf->hsf', hH, wqkv,
                         preferred_element_type=jnp.float32) + bqkv   # (H, S, 3DH)
        q = qkv[:, :, :DH] * ATT_SCALE                      # (H, S, DH)
        k = qkv[:, :, DH:2 * DH]
        v = qkv[:, :, 2 * DH:]

        s = jnp.einsum('hqd,hkd->hqk', q, k,
                       preferred_element_type=jnp.float32) + bias_h   # (H, S, S)
        mx = jnp.max(s, axis=-1, keepdims=True)
        p = jnp.exp(s - mx)
        p = p * pl.reciprocal(jnp.sum(p, axis=-1, keepdims=True), approx=True)
        ctx = jnp.einsum('hqk,hkd->hqd', p, v,
                         preferred_element_type=jnp.float32)          # (H, S, DH)

        # head-batched output projection, reduced over heads (no concat)
        proj = jnp.einsum('hsd,hdo->hso', ctx, wo_ref[l],
                          preferred_element_type=jnp.float32)         # (H, S, D)
        attn_out = jnp.sum(proj, axis=0) + bo_ref[l]                  # (S, D)
        h = _layernorm(attn_out + h, ln1_g_ref[l], ln1_b_ref[l])

        # FFN: w1 -> GELU -> w2 -> residual LN, all in VMEM
        ff = _gelu(jnp.dot(h, w1_ref[l],
                           preferred_element_type=jnp.float32) + b1_ref[l])
        ff = jnp.dot(ff, w2_ref[l],
                     preferred_element_type=jnp.float32) + b2_ref[l]
        h = _layernorm(ff + h, ln2_g_ref[l], ln2_b_ref[l])

    # ---- pooler epilogue: tanh(W @ h[0] + b) ----
    pooled = jnp.tanh(jnp.dot(h[0:1, :], wp_ref[...],
                              preferred_element_type=jnp.float32) + bp_ref[...])
    out_ref[0] = pooled                                     # (1, D)


# ------------------------------- parameters ---------------------------------
def init_params(key):
    def nrm(k, shape, scale=0.02):
        return (scale * jax.random.normal(k, shape)).astype(jnp.float32)

    keys = jax.random.split(key, 4 + L)
    params = {
        "wte": nrm(keys[0], (V, D)),
        "wpe": nrm(keys[1], (MAXPOS, D)),
        "wtype": nrm(keys[2], (1, D)),
        "emb_ln_g": jnp.ones((D,), jnp.float32),
        "emb_ln_b": jnp.zeros((D,), jnp.float32),
        "wp": nrm(keys[3], (D, D)),
        "bp": jnp.zeros((D,), jnp.float32),
        "layers": [],
    }
    for l in range(L):
        lk = jax.random.split(keys[4 + l], 6)
        params["layers"].append({
            "wq": nrm(lk[0], (D, D)), "bq": jnp.zeros((D,), jnp.float32),
            "wk": nrm(lk[1], (D, D)), "bk": jnp.zeros((D,), jnp.float32),
            "wv": nrm(lk[2], (D, D)), "bv": jnp.zeros((D,), jnp.float32),
            "wo": nrm(lk[3], (D, D)), "bo": jnp.zeros((D,), jnp.float32),
            "ln1_g": jnp.ones((D,), jnp.float32), "ln1_b": jnp.zeros((D,), jnp.float32),
            "w1": nrm(lk[4], (D, FF)), "b1": jnp.zeros((FF,), jnp.float32),
            "w2": nrm(lk[5], (FF, D)), "b2": jnp.zeros((D,), jnp.float32),
            "ln2_g": jnp.ones((D,), jnp.float32), "ln2_b": jnp.zeros((D,), jnp.float32),
        })
    return params


def pack_params(params):
    """Stack per-layer weights and repack QKV / out-proj into head-major layout."""
    def heads(w):                               # (D, D) -> (H, D, DH)
        return w.reshape(D, H, DH).transpose(1, 0, 2)

    wqkv3, bqkv3, wo3 = [], [], []
    bo, ln1_g, ln1_b = [], [], []
    w1, b1, w2, b2, ln2_g, ln2_b = [], [], [], [], [], []
    for p in params["layers"]:
        wqkv3.append(jnp.concatenate([heads(p["wq"]), heads(p["wk"]), heads(p["wv"])],
                                     axis=-1))                       # (H, D, 3DH)
        bqkv3.append(jnp.concatenate([p["bq"].reshape(H, 1, DH),
                                      p["bk"].reshape(H, 1, DH),
                                      p["bv"].reshape(H, 1, DH)], axis=-1))  # (H,1,3DH)
        wo3.append(p["wo"].reshape(H, DH, D))                        # (H, DH, D)
        bo.append(p["bo"].reshape(1, D))
        ln1_g.append(p["ln1_g"].reshape(1, D))
        ln1_b.append(p["ln1_b"].reshape(1, D))
        w1.append(p["w1"])
        b1.append(p["b1"].reshape(1, FF))
        w2.append(p["w2"])
        b2.append(p["b2"].reshape(1, D))
        ln2_g.append(p["ln2_g"].reshape(1, D))
        ln2_b.append(p["ln2_b"].reshape(1, D))

    return {
        "wte": params["wte"], "wpe": params["wpe"], "wtype": params["wtype"],
        "emb_ln_g": params["emb_ln_g"].reshape(1, D),
        "emb_ln_b": params["emb_ln_b"].reshape(1, D),
        "wqkv3": jnp.stack(wqkv3), "bqkv3": jnp.stack(bqkv3), "wo3": jnp.stack(wo3),
        "bo": jnp.stack(bo),
        "ln1_g": jnp.stack(ln1_g), "ln1_b": jnp.stack(ln1_b),
        "w1": jnp.stack(w1), "b1": jnp.stack(b1),
        "w2": jnp.stack(w2), "b2": jnp.stack(b2),
        "ln2_g": jnp.stack(ln2_g), "ln2_b": jnp.stack(ln2_b),
        "wp": params["wp"], "bp": params["bp"].reshape(1, D),
    }


# ------------------------------ forward pass --------------------------------
def graphcodebert_forward(packed, code_inputs, attn_mask, position_idx):
    """code_inputs branch of GraphCodeBERTWrapperModel.forward; returns pooled (B, D)."""
    # TODO(synk): nl_inputs branch (2-D mask + derived position ids) not implemented.
    attn_f = attn_mask.astype(jnp.float32)                           # (B, S, S)

    # embedding-table gathers stay in plain JAX glue
    word_emb = packed["wte"][code_inputs].astype(jnp.float32)        # (B, S, D)
    oemb = packed["wpe"][position_idx] + packed["wtype"][0][None, None, :]

    pos_col = position_idx[:, :, None].astype(jnp.int32)             # (B, S, 1)
    pos_row = position_idx[:, None, :].astype(jnp.int32)             # (B, 1, S)

    out = pl.pallas_call(
        fused_encoder_kernel,
        out_shape=jax.ShapeDtypeStruct((B, 1, D), jnp.float32),
        grid=(B,),
        in_specs=[
            pl.BlockSpec((1, S, 1), lambda i: (i, 0, 0)),            # pos_col
            pl.BlockSpec((1, 1, S), lambda i: (i, 0, 0)),            # pos_row
            pl.BlockSpec((1, S, S), lambda i: (i, 0, 0)),            # attn (0/1)
            pl.BlockSpec((1, S, D), lambda i: (i, 0, 0)),            # word emb
            pl.BlockSpec((1, S, D), lambda i: (i, 0, 0)),            # pos+type emb
            pl.BlockSpec((1, D), lambda i: (0, 0)),                  # emb LN gamma
            pl.BlockSpec((1, D), lambda i: (0, 0)),                  # emb LN beta
            pl.BlockSpec((L, H, D, 3 * DH), lambda i: (0, 0, 0, 0)),  # Wqkv (head-major)
            pl.BlockSpec((L, H, 1, 3 * DH), lambda i: (0, 0, 0, 0)),  # bqkv
            pl.BlockSpec((L, H, DH, D), lambda i: (0, 0, 0, 0)),      # Wo (head-major)
            pl.BlockSpec((L, 1, D), lambda i: (0, 0, 0)),            # bo
            pl.BlockSpec((L, 1, D), lambda i: (0, 0, 0)),            # LN1 gamma
            pl.BlockSpec((L, 1, D), lambda i: (0, 0, 0)),            # LN1 beta
            pl.BlockSpec((L, D, FF), lambda i: (0, 0, 0)),           # W1
            pl.BlockSpec((L, 1, FF), lambda i: (0, 0, 0)),           # b1
            pl.BlockSpec((L, FF, D), lambda i: (0, 0, 0)),           # W2
            pl.BlockSpec((L, 1, D), lambda i: (0, 0, 0)),            # b2
            pl.BlockSpec((L, 1, D), lambda i: (0, 0, 0)),            # LN2 gamma
            pl.BlockSpec((L, 1, D), lambda i: (0, 0, 0)),            # LN2 beta
            pl.BlockSpec((D, D), lambda i: (0, 0)),                  # pooler W
            pl.BlockSpec((1, D), lambda i: (0, 0)),                  # pooler b
        ],
        out_specs=pl.BlockSpec((1, 1, D), lambda i: (i, 0, 0)),
        compiler_params=pltpu.CompilerParams(dimension_semantics=("parallel",)),
    )(pos_col, pos_row, attn_f, word_emb, oemb,
      packed["emb_ln_g"], packed["emb_ln_b"],
      packed["wqkv3"], packed["bqkv3"], packed["wo3"], packed["bo"],
      packed["ln1_g"], packed["ln1_b"],
      packed["w1"], packed["b1"], packed["w2"], packed["b2"],
      packed["ln2_g"], packed["ln2_b"],
      packed["wp"], packed["bp"])
    return out[:, 0, :]                                              # (B, D)


# ---------------------------------- main -------------------------------------
if __name__ == "__main__":
    key = jax.random.PRNGKey(0)
    k_param, k_tok = jax.random.split(key)

    params = init_params(k_param)
    packed = pack_params(params)

    code_inputs = jax.random.randint(k_tok, (B, S), 0, V, dtype=jnp.int32)
    # position_idx semantics (GraphCodeBERT): 0 = DFG node, 1 = pad, >=2 = code token
    position_idx = jnp.array([[2, 3, 4, 5, 6, 0, 0, 1],
                              [2, 3, 4, 0, 0, 0, 1, 1]], dtype=jnp.int32)
    valid = position_idx != 1
    attn_mask = (valid[:, :, None] & valid[:, None, :])              # (B, S, S) bool

    fwd = jax.jit(functools.partial(graphcodebert_forward, packed))
    pooled = fwd(code_inputs, attn_mask, position_idx)
    jax.block_until_ready(pooled)

    assert pooled.shape == (B, D)
    assert jnp.all(jnp.isfinite(pooled))
    print("KERNEL_OK")
</pallas_src>

<mosaic_0001>
module attributes {stable_mosaic.version = 11 : i64} {
  func.func @fused_encoder_kernel(%arg0: i32, %arg1: memref<1x8x1xi32, #tpu.memory_space<vmem>>, %arg2: memref<1x1x8xi32, #tpu.memory_space<vmem>>, %arg3: memref<1x8x8xf32, #tpu.memory_space<vmem>>, %arg4: memref<1x8x32xf32, #tpu.memory_space<vmem>>, %arg5: memref<1x8x32xf32, #tpu.memory_space<vmem>>, %arg6: memref<1x32xf32, #tpu.memory_space<vmem>>, %arg7: memref<1x32xf32, #tpu.memory_space<vmem>>, %arg8: memref<2x4x32x24xf32, #tpu.memory_space<vmem>>, %arg9: memref<2x4x1x24xf32, #tpu.memory_space<vmem>>, %arg10: memref<2x4x8x32xf32, #tpu.memory_space<vmem>>, %arg11: memref<2x1x32xf32, #tpu.memory_space<vmem>>, %arg12: memref<2x1x32xf32, #tpu.memory_space<vmem>>, %arg13: memref<2x1x32xf32, #tpu.memory_space<vmem>>, %arg14: memref<2x32x64xf32, #tpu.memory_space<vmem>>, %arg15: memref<2x1x64xf32, #tpu.memory_space<vmem>>, %arg16: memref<2x64x32xf32, #tpu.memory_space<vmem>>, %arg17: memref<2x1x32xf32, #tpu.memory_space<vmem>>, %arg18: memref<2x1x32xf32, #tpu.memory_space<vmem>>, %arg19: memref<2x1x32xf32, #tpu.memory_space<vmem>>, %arg20: memref<32x32xf32, #tpu.memory_space<vmem>>, %arg21: memref<1x32xf32, #tpu.memory_space<vmem>>, %arg22: memref<1x1x32xf32, #tpu.memory_space<vmem>>) attributes {dimension_semantics = [#tpu.dimension_semantics<parallel>], iteration_bounds = array<i64: 2>, scalar_prefetch = 0 : i64, scratch_operands = 0 : i64, tpu.core_type = #tpu.core_type<tc>, window_params = [{transform_indices = @transform_0, window_bounds = array<i64: 1, 8, 1>}, {transform_indices = @transform_1, window_bounds = array<i64: 1, 1, 8>}, {transform_indices = @transform_2, window_bounds = array<i64: 1, 8, 8>}, {transform_indices = @transform_3, window_bounds = array<i64: 1, 8, 32>}, {transform_indices = @transform_4, window_bounds = array<i64: 1, 8, 32>}, {pipeline_mode = #tpu.pipeline_mode<synchronous>, transform_indices = @transform_5, window_bounds = array<i64: 1, 32>}, {pipeline_mode = #tpu.pipeline_mode<synchronous>, transform_indices = @transform_6, window_bounds = array<i64: 1, 32>}, {pipeline_mode = #tpu.pipeline_mode<synchronous>, transform_indices = @transform_7, window_bounds = array<i64: 2, 4, 32, 24>}, {pipeline_mode = #tpu.pipeline_mode<synchronous>, transform_indices = @transform_8, window_bounds = array<i64: 2, 4, 1, 24>}, {pipeline_mode = #tpu.pipeline_mode<synchronous>, transform_indices = @transform_9, window_bounds = array<i64: 2, 4, 8, 32>}, {pipeline_mode = #tpu.pipeline_mode<synchronous>, transform_indices = @transform_10, window_bounds = array<i64: 2, 1, 32>}, {pipeline_mode = #tpu.pipeline_mode<synchronous>, transform_indices = @transform_11, window_bounds = array<i64: 2, 1, 32>}, {pipeline_mode = #tpu.pipeline_mode<synchronous>, transform_indices = @transform_12, window_bounds = array<i64: 2, 1, 32>}, {pipeline_mode = #tpu.pipeline_mode<synchronous>, transform_indices = @transform_13, window_bounds = array<i64: 2, 32, 64>}, {pipeline_mode = #tpu.pipeline_mode<synchronous>, transform_indices = @transform_14, window_bounds = array<i64: 2, 1, 64>}, {pipeline_mode = #tpu.pipeline_mode<synchronous>, transform_indices = @transform_15, window_bounds = array<i64: 2, 64, 32>}, {pipeline_mode = #tpu.pipeline_mode<synchronous>, transform_indices = @transform_16, window_bounds = array<i64: 2, 1, 32>}, {pipeline_mode = #tpu.pipeline_mode<synchronous>, transform_indices = @transform_17, window_bounds = array<i64: 2, 1, 32>}, {pipeline_mode = #tpu.pipeline_mode<synchronous>, transform_indices = @transform_18, window_bounds = array<i64: 2, 1, 32>}, {pipeline_mode = #tpu.pipeline_mode<synchronous>, transform_indices = @transform_19, window_bounds = array<i64: 32, 32>}, {pipeline_mode = #tpu.pipeline_mode<synchronous>, transform_indices = @transform_20, window_bounds = array<i64: 1, 32>}, {transform_indices = @transform_21, window_bounds = array<i64: 1, 1, 32>}]} {
    %c0 = arith.constant 0 : index
    %c0_0 = arith.constant 0 : index
    %c0_1 = arith.constant 0 : index
    %0 = vector.load %arg1[%c0, %c0_0, %c0_1] : memref<1x8x1xi32, #tpu.memory_space<vmem>>, vector<1x8x1xi32>
    %1 = vector.shape_cast %0 : vector<1x8x1xi32> to vector<8x1xi32>
    %c0_2 = arith.constant 0 : index
    %c0_3 = arith.constant 0 : index
    %c0_4 = arith.constant 0 : index
    %2 = vector.load %arg2[%c0_2, %c0_3, %c0_4] : memref<1x1x8xi32, #tpu.memory_space<vmem>>, vector<1x1x8xi32>
    %3 = vector.shape_cast %2 : vector<1x1x8xi32> to vector<1x8xi32>
    %c0_5 = arith.constant 0 : index
    %c0_6 = arith.constant 0 : index
    %c0_7 = arith.constant 0 : index
    %4 = vector.load %arg3[%c0_5, %c0_6, %c0_7] : memref<1x8x8xf32, #tpu.memory_space<vmem>>, vector<1x8x8xf32>
    %5 = vector.shape_cast %4 : vector<1x8x8xf32> to vector<8x8xf32>
    %c0_8 = arith.constant 0 : index
    %c0_9 = arith.constant 0 : index
    %c0_10 = arith.constant 0 : index
    %6 = vector.load %arg4[%c0_8, %c0_9, %c0_10] : memref<1x8x32xf32, #tpu.memory_space<vmem>>, vector<1x8x32xf32>
    %7 = vector.shape_cast %6 : vector<1x8x32xf32> to vector<8x32xf32>
    %c0_i32 = arith.constant 0 : i32
    %8 = vector.broadcast %c0_i32 : i32 to vector<8x1xi32>
    %9 = arith.cmpi eq, %1, %8 : vector<8x1xi32>
    %10 = arith.extui %9 : vector<8x1xi1> to vector<8x1xi32>
    %11 = arith.sitofp %10 : vector<8x1xi32> to vector<8x1xf32>
    %c2_i32 = arith.constant 2 : i32
    %12 = vector.broadcast %c2_i32 : i32 to vector<1x8xi32>
    %13 = arith.cmpi sge, %3, %12 : vector<1x8xi32>
    %14 = arith.extui %13 : vector<1x8xi1> to vector<1x8xi32>
    %15 = arith.sitofp %14 : vector<1x8xi32> to vector<1x8xf32>
    %16 = vector.broadcast %11 : vector<8x1xf32> to vector<8x8xf32>
    %17 = vector.broadcast %15 : vector<1x8xf32> to vector<8x8xf32>
    %18 = arith.mulf %16, %17 : vector<8x8xf32>
    %19 = arith.mulf %18, %5 : vector<8x8xf32>
    %cst = arith.constant dense<0.000000e+00> : vector<8xf32>
    %20 = vector.multi_reduction <add>, %19, %cst [1] : vector<8x8xf32> to vector<8xf32>
    %21 = vector.shape_cast %20 : vector<8xf32> to vector<8x1xf32>
    %cst_11 = arith.constant 1.000000e-10 : f32
    %22 = vector.broadcast %cst_11 : f32 to vector<8x1xf32>
    %23 = arith.addf %21, %22 : vector<8x1xf32>
    %24 = tpu.reciprocal %23 {approx = true} : vector<8x1xf32> -> vector<8x1xf32>
    %25 = vector.broadcast %24 : vector<8x1xf32> to vector<8x8xf32>
    %26 = arith.mulf %19, %25 : vector<8x8xf32>
    %cst_12 = arith.constant dense<0.000000e+00> : vector<8x32xf32>
    %27 = tpu.matmul %26, %7, %cst_12 {dimension_numbers = #tpu.dot_dimension_numbers<[1], [0], [0], [1], [0, 0, 1, 1], [], []>} : vector<8x8xf32>, vector<8x32xf32>, vector<8x32xf32> -> vector<8x32xf32>
    %cst_13 = arith.constant 1.000000e+00 : f32
    %28 = vector.broadcast %cst_13 : f32 to vector<8x1xf32>
    %29 = arith.subf %28, %11 : vector<8x1xf32>
    %30 = vector.broadcast %29 : vector<8x1xf32> to vector<8x32xf32>
    %31 = arith.mulf %7, %30 : vector<8x32xf32>
    %32 = vector.broadcast %11 : vector<8x1xf32> to vector<8x32xf32>
    %33 = arith.mulf %27, %32 : vector<8x32xf32>
    %34 = arith.addf %31, %33 : vector<8x32xf32>
    %c0_14 = arith.constant 0 : index
    %c0_15 = arith.constant 0 : index
    %c0_16 = arith.constant 0 : index
    %35 = vector.load %arg5[%c0_14, %c0_15, %c0_16] : memref<1x8x32xf32, #tpu.memory_space<vmem>>, vector<1x8x32xf32>
    %36 = vector.shape_cast %35 : vector<1x8x32xf32> to vector<8x32xf32>
    %37 = arith.addf %34, %36 : vector<8x32xf32>
    %c0_17 = arith.constant 0 : index
    %c0_18 = arith.constant 0 : index
    %38 = vector.load %arg6[%c0_17, %c0_18] : memref<1x32xf32, #tpu.memory_space<vmem>>, vector<1x32xf32>
    %c0_19 = arith.constant 0 : index
    %c0_20 = arith.constant 0 : index
    %39 = vector.load %arg7[%c0_19, %c0_20] : memref<1x32xf32, #tpu.memory_space<vmem>>, vector<1x32xf32>
    %cst_21 = arith.constant dense<0.000000e+00> : vector<8xf32>
    %40 = vector.multi_reduction <add>, %37, %cst_21 [1] : vector<8x32xf32> to vector<8xf32>
    %41 = vector.shape_cast %40 : vector<8xf32> to vector<8x1xf32>
    %cst_22 = arith.constant 3.200000e+01 : f32
    %42 = vector.broadcast %cst_22 : f32 to vector<8x1xf32>
    %43 = arith.divf %41, %42 : vector<8x1xf32>
    %44 = vector.broadcast %43 : vector<8x1xf32> to vector<8x32xf32>
    %45 = arith.subf %37, %44 : vector<8x32xf32>
    %46 = arith.mulf %45, %45 : vector<8x32xf32>
    %cst_23 = arith.constant dense<0.000000e+00> : vector<8xf32>
    %47 = vector.multi_reduction <add>, %46, %cst_23 [1] : vector<8x32xf32> to vector<8xf32>
    %48 = vector.shape_cast %47 : vector<8xf32> to vector<8x1xf32>
    %cst_24 = arith.constant 3.200000e+01 : f32
    %49 = vector.broadcast %cst_24 : f32 to vector<8x1xf32>
    %50 = arith.divf %48, %49 : vector<8x1xf32>
    %cst_25 = arith.constant 9.99999974E-6 : f32
    %51 = vector.broadcast %cst_25 : f32 to vector<8x1xf32>
    %52 = arith.addf %50, %51 : vector<8x1xf32>
    %53 = math.rsqrt %52 : vector<8x1xf32>
    %54 = vector.broadcast %53 : vector<8x1xf32> to vector<8x32xf32>
    %55 = arith.mulf %45, %54 : vector<8x32xf32>
    %56 = vector.broadcast %38 : vector<1x32xf32> to vector<8x32xf32>
    %57 = arith.mulf %55, %56 : vector<8x32xf32>
    %58 = vector.broadcast %39 : vector<1x32xf32> to vector<8x32xf32>
    %59 = arith.addf %57, %58 : vector<8x32xf32>
    %cst_26 = arith.constant 1.000000e+00 : f32
    %60 = vector.broadcast %cst_26 : f32 to vector<8x8xf32>
    %61 = arith.subf %60, %5 : vector<8x8xf32>
    %cst_27 = arith.constant -1.000000e+09 : f32
    %62 = vector.broadcast %cst_27 : f32 to vector<8x8xf32>
    %63 = arith.mulf %61, %62 : vector<8x8xf32>
    %64 = vector.shape_cast %63 : vector<8x8xf32> to vector<1x8x8xf32>
    %c0_28 = arith.constant 0 : index
    %c0_29 = arith.constant 0 : index
    %c0_30 = arith.constant 0 : index
    %c0_31 = arith.constant 0 : index
    %65 = vector.load %arg8[%c0_28, %c0_29, %c0_30, %c0_31] : memref<2x4x32x24xf32, #tpu.memory_space<vmem>>, vector<1x4x32x24xf32>
    %66 = vector.shape_cast %65 : vector<1x4x32x24xf32> to vector<4x32x24xf32>
    %c0_32 = arith.constant 0 : index
    %c0_33 = arith.constant 0 : index
    %c0_34 = arith.constant 0 : index
    %c0_35 = arith.constant 0 : index
    %67 = vector.load %arg9[%c0_32, %c0_33, %c0_34, %c0_35] : memref<2x4x1x24xf32, #tpu.memory_space<vmem>>, vector<1x4x1x24xf32>
    %68 = vector.shape_cast %67 : vector<1x4x1x24xf32> to vector<4x1x24xf32>
    %69 = vector.shape_cast %59 : vector<8x32xf32> to vector<1x8x32xf32>
    %70 = vector.shape_cast %69 : vector<1x8x32xf32> to vector<1x8x32xf32>
    %71 = vector.broadcast %70 : vector<1x8x32xf32> to vector<4x8x32xf32>
    "tpu.trace_start"() <{level = 10 : i32, message = "hsd,hdf->hsf"}> : () -> ()
    %cst_36 = arith.constant dense<0.000000e+00> : vector<4x8x24xf32>
    %72 = tpu.matmul %71, %66, %cst_36 {dimension_numbers = #tpu.dot_dimension_numbers<[2], [1], [1], [2], [0, 0, 0, 1, 1, 2], [0], [0]>} : vector<4x8x32xf32>, vector<4x32x24xf32>, vector<4x8x24xf32> -> vector<4x8x24xf32>
    "tpu.trace_stop"() : () -> ()
    %73 = vector.broadcast %68 : vector<4x1x24xf32> to vector<4x8x24xf32>
    %74 = arith.addf %72, %73 : vector<4x8x24xf32>
    %75 = vector.extract_strided_slice %74 {offsets = [0, 0, 0], sizes = [4, 8, 8], strides = [1, 1, 1]} : vector<4x8x24xf32> to vector<4x8x8xf32>
    %cst_37 = arith.constant 0.353553385 : f32
    %76 = vector.broadcast %cst_37 : f32 to vector<4x8x8xf32>
    %77 = arith.mulf %75, %76 : vector<4x8x8xf32>
    %78 = vector.extract_strided_slice %74 {offsets = [0, 0, 8], sizes = [4, 8, 8], strides = [1, 1, 1]} : vector<4x8x24xf32> to vector<4x8x8xf32>
    %79 = vector.extract_strided_slice %74 {offsets = [0, 0, 16], sizes = [4, 8, 8], strides = [1, 1, 1]} : vector<4x8x24xf32> to vector<4x8x8xf32>
    "tpu.trace_start"() <{level = 10 : i32, message = "hqd,hkd->hqk"}> : () -> ()
    %cst_38 = arith.constant dense<0.000000e+00> : vector<4x8x8xf32>
    %80 = tpu.matmul %77, %78, %cst_38 {dimension_numbers = #tpu.dot_dimension_numbers<[2], [2], [1], [1], [0, 0, 0, 1, 1, 1], [0], [0]>} : vector<4x8x8xf32>, vector<4x8x8xf32>, vector<4x8x8xf32> -> vector<4x8x8xf32>
    "tpu.trace_stop"() : () -> ()
    %81 = vector.broadcast %64 : vector<1x8x8xf32> to vector<4x8x8xf32>
    %82 = arith.addf %80, %81 : vector<4x8x8xf32>
    %cst_39 = arith.constant dense<0xFF800000> : vector<4x8xf32>
    %83 = vector.multi_reduction <maximumf>, %82, %cst_39 [2] : vector<4x8x8xf32> to vector<4x8xf32>
    %84 = vector.shape_cast %83 : vector<4x8xf32> to vector<4x8x1xf32>
    %85 = vector.broadcast %84 : vector<4x8x1xf32> to vector<4x8x8xf32>
    %86 = arith.subf %82, %85 : vector<4x8x8xf32>
    %87 = math.exp %86 : vector<4x8x8xf32>
    %cst_40 = arith.constant dense<0.000000e+00> : vector<4x8xf32>
    %88 = vector.multi_reduction <add>, %87, %cst_40 [2] : vector<4x8x8xf32> to vector<4x8xf32>
    %89 = vector.shape_cast %88 : vector<4x8xf32> to vector<4x8x1xf32>
    %90 = tpu.reciprocal %89 {approx = true} : vector<4x8x1xf32> -> vector<4x8x1xf32>
    %91 = vector.broadcast %90 : vector<4x8x1xf32> to vector<4x8x8xf32>
    %92 = arith.mulf %87, %91 : vector<4x8x8xf32>
    "tpu.trace_start"() <{level = 10 : i32, message = "hqk,hkd->hqd"}> : () -> ()
    %cst_41 = arith.constant dense<0.000000e+00> : vector<4x8x8xf32>
    %93 = tpu.matmul %92, %79, %cst_41 {dimension_numbers = #tpu.dot_dimension_numbers<[2], [1], [1], [2], [0, 0, 0, 1, 1, 2], [0], [0]>} : vector<4x8x8xf32>, vector<4x8x8xf32>, vector<4x8x8xf32> -> vector<4x8x8xf32>
    "tpu.trace_stop"() : () -> ()
    %c0_42 = arith.constant 0 : index
    %c0_43 = arith.constant 0 : index
    %c0_44 = arith.constant 0 : index
    %c0_45 = arith.constant 0 : index
    %94 = vector.load %arg10[%c0_42, %c0_43, %c0_44, %c0_45] : memref<2x4x8x32xf32, #tpu.memory_space<vmem>>, vector<1x4x8x32xf32>
    %95 = vector.shape_cast %94 : vector<1x4x8x32xf32> to vector<4x8x32xf32>
    "tpu.trace_start"() <{level = 10 : i32, message = "hsd,hdo->hso"}> : () -> ()
    %cst_46 = arith.constant dense<0.000000e+00> : vector<4x8x32xf32>
    %96 = tpu.matmul %93, %95, %cst_46 {dimension_numbers = #tpu.dot_dimension_numbers<[2], [1], [1], [2], [0, 0, 0, 1, 1, 2], [0], [0]>} : vector<4x8x8xf32>, vector<4x8x32xf32>, vector<4x8x32xf32> -> vector<4x8x32xf32>
    "tpu.trace_stop"() : () -> ()
    %cst_47 = arith.constant dense<0.000000e+00> : vector<8x32xf32>
    %97 = vector.multi_reduction <add>, %96, %cst_47 [0] : vector<4x8x32xf32> to vector<8x32xf32>
    %c0_48 = arith.constant 0 : index
    %c0_49 = arith.constant 0 : index
    %c0_50 = arith.constant 0 : index
    %98 = vector.load %arg11[%c0_48, %c0_49, %c0_50] : memref<2x1x32xf32, #tpu.memory_space<vmem>>, vector<1x1x32xf32>
    %99 = vector.shape_cast %98 : vector<1x1x32xf32> to vector<1x32xf32>
    %100 = vector.broadcast %99 : vector<1x32xf32> to vector<8x32xf32>
    %101 = arith.addf %97, %100 : vector<8x32xf32>
    %102 = arith.addf %101, %59 : vector<8x32xf32>
    %c0_51 = arith.constant 0 : index
    %c0_52 = arith.constant 0 : index
    %c0_53 = arith.constant 0 : index
    %103 = vector.load %arg12[%c0_51, %c0_52, %c0_53] : memref<2x1x32xf32, #tpu.memory_space<vmem>>, vector<1x1x32xf32>
    %104 = vector.shape_cast %103 : vector<1x1x32xf32> to vector<1x32xf32>
    %c0_54 = arith.constant 0 : index
    %c0_55 = arith.constant 0 : index
    %c0_56 = arith.constant 0 : index
    %105 = vector.load %arg13[%c0_54, %c0_55, %c0_56] : memref<2x1x32xf32, #tpu.memory_space<vmem>>, vector<1x1x32xf32>
    %106 = vector.shape_cast %105 : vector<1x1x32xf32> to vector<1x32xf32>
    %cst_57 = arith.constant dense<0.000000e+00> : vector<8xf32>
    %107 = vector.multi_reduction <add>, %102, %cst_57 [1] : vector<8x32xf32> to vector<8xf32>
    %108 = vector.shape_cast %107 : vector<8xf32> to vector<8x1xf32>
    %cst_58 = arith.constant 3.200000e+01 : f32
    %109 = vector.broadcast %cst_58 : f32 to vector<8x1xf32>
    %110 = arith.divf %108, %109 : vector<8x1xf32>
    %111 = vector.broadcast %110 : vector<8x1xf32> to vector<8x32xf32>
    %112 = arith.subf %102, %111 : vector<8x32xf32>
    %113 = arith.mulf %112, %112 : vector<8x32xf32>
    %cst_59 = arith.constant dense<0.000000e+00> : vector<8xf32>
    %114 = vector.multi_reduction <add>, %113, %cst_59 [1] : vector<8x32xf32> to vector<8xf32>
    %115 = vector.shape_cast %114 : vector<8xf32> to vector<8x1xf32>
    %cst_60 = arith.constant 3.200000e+01 : f32
    %116 = vector.broadcast %cst_60 : f32 to vector<8x1xf32>
    %117 = arith.divf %115, %116 : vector<8x1xf32>
    %cst_61 = arith.constant 9.99999974E-6 : f32
    %118 = vector.broadcast %cst_61 : f32 to vector<8x1xf32>
    %119 = arith.addf %117, %118 : vector<8x1xf32>
    %120 = math.rsqrt %119 : vector<8x1xf32>
    %121 = vector.broadcast %120 : vector<8x1xf32> to vector<8x32xf32>
    %122 = arith.mulf %112, %121 : vector<8x32xf32>
    %123 = vector.broadcast %104 : vector<1x32xf32> to vector<8x32xf32>
    %124 = arith.mulf %122, %123 : vector<8x32xf32>
    %125 = vector.broadcast %106 : vector<1x32xf32> to vector<8x32xf32>
    %126 = arith.addf %124, %125 : vector<8x32xf32>
    %c0_62 = arith.constant 0 : index
    %c0_63 = arith.constant 0 : index
    %c0_64 = arith.constant 0 : index
    %127 = vector.load %arg14[%c0_62, %c0_63, %c0_64] : memref<2x32x64xf32, #tpu.memory_space<vmem>>, vector<1x32x64xf32>
    %128 = vector.shape_cast %127 : vector<1x32x64xf32> to vector<32x64xf32>
    %cst_65 = arith.constant dense<0.000000e+00> : vector<8x64xf32>
    %129 = tpu.matmul %126, %128, %cst_65 {dimension_numbers = #tpu.dot_dimension_numbers<[1], [0], [0], [1], [0, 0, 1, 1], [], []>} : vector<8x32xf32>, vector<32x64xf32>, vector<8x64xf32> -> vector<8x64xf32>
    %c0_66 = arith.constant 0 : index
    %c0_67 = arith.constant 0 : index
    %c0_68 = arith.constant 0 : index
    %130 = vector.load %arg15[%c0_66, %c0_67, %c0_68] : memref<2x1x64xf32, #tpu.memory_space<vmem>>, vector<1x1x64xf32>
    %131 = vector.shape_cast %130 : vector<1x1x64xf32> to vector<1x64xf32>
    %132 = vector.broadcast %131 : vector<1x64xf32> to vector<8x64xf32>
    %133 = arith.addf %129, %132 : vector<8x64xf32>
    %cst_69 = arith.constant 5.000000e-01 : f32
    %134 = vector.broadcast %cst_69 : f32 to vector<8x64xf32>
    %135 = arith.mulf %134, %133 : vector<8x64xf32>
    %cst_70 = arith.constant 4.471500e-02 : f32
    %136 = vector.broadcast %cst_70 : f32 to vector<8x64xf32>
    %137 = arith.mulf %136, %133 : vector<8x64xf32>
    %138 = arith.mulf %137, %133 : vector<8x64xf32>
    %139 = arith.mulf %138, %133 : vector<8x64xf32>
    %140 = arith.addf %133, %139 : vector<8x64xf32>
    %cst_71 = arith.constant 0.797884583 : f32
    %141 = vector.broadcast %cst_71 : f32 to vector<8x64xf32>
    %142 = arith.mulf %141, %140 : vector<8x64xf32>
    %143 = math.tanh %142 : vector<8x64xf32>
    %cst_72 = arith.constant 1.000000e+00 : f32
    %144 = vector.broadcast %cst_72 : f32 to vector<8x64xf32>
    %145 = arith.addf %144, %143 : vector<8x64xf32>
    %146 = arith.mulf %135, %145 : vector<8x64xf32>
    %c0_73 = arith.constant 0 : index
    %c0_74 = arith.constant 0 : index
    %c0_75 = arith.constant 0 : index
    %147 = vector.load %arg16[%c0_73, %c0_74, %c0_75] : memref<2x64x32xf32, #tpu.memory_space<vmem>>, vector<1x64x32xf32>
    %148 = vector.shape_cast %147 : vector<1x64x32xf32> to vector<64x32xf32>
    %cst_76 = arith.constant dense<0.000000e+00> : vector<8x32xf32>
    %149 = tpu.matmul %146, %148, %cst_76 {dimension_numbers = #tpu.dot_dimension_numbers<[1], [0], [0], [1], [0, 0, 1, 1], [], []>} : vector<8x64xf32>, vector<64x32xf32>, vector<8x32xf32> -> vector<8x32xf32>
    %c0_77 = arith.constant 0 : index
    %c0_78 = arith.constant 0 : index
    %c0_79 = arith.constant 0 : index
    %150 = vector.load %arg17[%c0_77, %c0_78, %c0_79] : memref<2x1x32xf32, #tpu.memory_space<vmem>>, vector<1x1x32xf32>
    %151 = vector.shape_cast %150 : vector<1x1x32xf32> to vector<1x32xf32>
    %152 = vector.broadcast %151 : vector<1x32xf32> to vector<8x32xf32>
    %153 = arith.addf %149, %152 : vector<8x32xf32>
    %154 = arith.addf %153, %126 : vector<8x32xf32>
    %c0_80 = arith.constant 0 : index
    %c0_81 = arith.constant 0 : index
    %c0_82 = arith.constant 0 : index
    %155 = vector.load %arg18[%c0_80, %c0_81, %c0_82] : memref<2x1x32xf32, #tpu.memory_space<vmem>>, vector<1x1x32xf32>
    %156 = vector.shape_cast %155 : vector<1x1x32xf32> to vector<1x32xf32>
    %c0_83 = arith.constant 0 : index
    %c0_84 = arith.constant 0 : index
    %c0_85 = arith.constant 0 : index
    %157 = vector.load %arg19[%c0_83, %c0_84, %c0_85] : memref<2x1x32xf32, #tpu.memory_space<vmem>>, vector<1x1x32xf32>
    %158 = vector.shape_cast %157 : vector<1x1x32xf32> to vector<1x32xf32>
    %cst_86 = arith.constant dense<0.000000e+00> : vector<8xf32>
    %159 = vector.multi_reduction <add>, %154, %cst_86 [1] : vector<8x32xf32> to vector<8xf32>
    %160 = vector.shape_cast %159 : vector<8xf32> to vector<8x1xf32>
    %cst_87 = arith.constant 3.200000e+01 : f32
    %161 = vector.broadcast %cst_87 : f32 to vector<8x1xf32>
    %162 = arith.divf %160, %161 : vector<8x1xf32>
    %163 = vector.broadcast %162 : vector<8x1xf32> to vector<8x32xf32>
    %164 = arith.subf %154, %163 : vector<8x32xf32>
    %165 = arith.mulf %164, %164 : vector<8x32xf32>
    %cst_88 = arith.constant dense<0.000000e+00> : vector<8xf32>
    %166 = vector.multi_reduction <add>, %165, %cst_88 [1] : vector<8x32xf32> to vector<8xf32>
    %167 = vector.shape_cast %166 : vector<8xf32> to vector<8x1xf32>
    %cst_89 = arith.constant 3.200000e+01 : f32
    %168 = vector.broadcast %cst_89 : f32 to vector<8x1xf32>
    %169 = arith.divf %167, %168 : vector<8x1xf32>
    %cst_90 = arith.constant 9.99999974E-6 : f32
    %170 = vector.broadcast %cst_90 : f32 to vector<8x1xf32>
    %171 = arith.addf %169, %170 : vector<8x1xf32>
    %172 = math.rsqrt %171 : vector<8x1xf32>
    %173 = vector.broadcast %172 : vector<8x1xf32> to vector<8x32xf32>
    %174 = arith.mulf %164, %173 : vector<8x32xf32>
    %175 = vector.broadcast %156 : vector<1x32xf32> to vector<8x32xf32>
    %176 = arith.mulf %174, %175 : vector<8x32xf32>
    %177 = vector.broadcast %158 : vector<1x32xf32> to vector<8x32xf32>
    %178 = arith.addf %176, %177 : vector<8x32xf32>
    %c1 = arith.constant 1 : index
    %c0_91 = arith.constant 0 : index
    %c0_92 = arith.constant 0 : index
    %c0_93 = arith.constant 0 : index
    %179 = vector.load %arg8[%c1, %c0_91, %c0_92, %c0_93] : memref<2x4x32x24xf32, #tpu.memory_space<vmem>>, vector<1x4x32x24xf32>
    %180 = vector.shape_cast %179 : vector<1x4x32x24xf32> to vector<4x32x24xf32>
    %c1_94 = arith.constant 1 : index
    %c0_95 = arith.constant 0 : index
    %c0_96 = arith.constant 0 : index
    %c0_97 = arith.constant 0 : index
    %181 = vector.load %arg9[%c1_94, %c0_95, %c0_96, %c0_97] : memref<2x4x1x24xf32, #tpu.memory_space<vmem>>, vector<1x4x1x24xf32>
    %182 = vector.shape_cast %181 : vector<1x4x1x24xf32> to vector<4x1x24xf32>
    %183 = vector.shape_cast %178 : vector<8x32xf32> to vector<1x8x32xf32>
    %184 = vector.shape_cast %183 : vector<1x8x32xf32> to vector<1x8x32xf32>
    %185 = vector.broadcast %184 : vector<1x8x32xf32> to vector<4x8x32xf32>
    "tpu.trace_start"() <{level = 10 : i32, message = "hsd,hdf->hsf"}> : () -> ()
    %cst_98 = arith.constant dense<0.000000e+00> : vector<4x8x24xf32>
    %186 = tpu.matmul %185, %180, %cst_98 {dimension_numbers = #tpu.dot_dimension_numbers<[2], [1], [1], [2], [0, 0, 0, 1, 1, 2], [0], [0]>} : vector<4x8x32xf32>, vector<4x32x24xf32>, vector<4x8x24xf32> -> vector<4x8x24xf32>
    "tpu.trace_stop"() : () -> ()
    %187 = vector.broadcast %182 : vector<4x1x24xf32> to vector<4x8x24xf32>
    %188 = arith.addf %186, %187 : vector<4x8x24xf32>
    %189 = vector.extract_strided_slice %188 {offsets = [0, 0, 0], sizes = [4, 8, 8], strides = [1, 1, 1]} : vector<4x8x24xf32> to vector<4x8x8xf32>
    %cst_99 = arith.constant 0.353553385 : f32
    %190 = vector.broadcast %cst_99 : f32 to vector<4x8x8xf32>
    %191 = arith.mulf %189, %190 : vector<4x8x8xf32>
    %192 = vector.extract_strided_slice %188 {offsets = [0, 0, 8], sizes = [4, 8, 8], strides = [1, 1, 1]} : vector<4x8x24xf32> to vector<4x8x8xf32>
    %193 = vector.extract_strided_slice %188 {offsets = [0, 0, 16], sizes = [4, 8, 8], strides = [1, 1, 1]} : vector<4x8x24xf32> to vector<4x8x8xf32>
    "tpu.trace_start"() <{level = 10 : i32, message = "hqd,hkd->hqk"}> : () -> ()
    %cst_100 = arith.constant dense<0.000000e+00> : vector<4x8x8xf32>
    %194 = tpu.matmul %191, %192, %cst_100 {dimension_numbers = #tpu.dot_dimension_numbers<[2], [2], [1], [1], [0, 0, 0, 1, 1, 1], [0], [0]>} : vector<4x8x8xf32>, vector<4x8x8xf32>, vector<4x8x8xf32> -> vector<4x8x8xf32>
    "tpu.trace_stop"() : () -> ()
    %195 = vector.broadcast %64 : vector<1x8x8xf32> to vector<4x8x8xf32>
    %196 = arith.addf %194, %195 : vector<4x8x8xf32>
    %cst_101 = arith.constant dense<0xFF800000> : vector<4x8xf32>
    %197 = vector.multi_reduction <maximumf>, %196, %cst_101 [2] : vector<4x8x8xf32> to vector<4x8xf32>
    %198 = vector.shape_cast %197 : vector<4x8xf32> to vector<4x8x1xf32>
    %199 = vector.broadcast %198 : vector<4x8x1xf32> to vector<4x8x8xf32>
    %200 = arith.subf %196, %199 : vector<4x8x8xf32>
    %201 = math.exp %200 : vector<4x8x8xf32>
    %cst_102 = arith.constant dense<0.000000e+00> : vector<4x8xf32>
    %202 = vector.multi_reduction <add>, %201, %cst_102 [2] : vector<4x8x8xf32> to vector<4x8xf32>
    %203 = vector.shape_cast %202 : vector<4x8xf32> to vector<4x8x1xf32>
    %204 = tpu.reciprocal %203 {approx = true} : vector<4x8x1xf32> -> vector<4x8x1xf32>
    %205 = vector.broadcast %204 : vector<4x8x1xf32> to vector<4x8x8xf32>
    %206 = arith.mulf %201, %205 : vector<4x8x8xf32>
    "tpu.trace_start"() <{level = 10 : i32, message = "hqk,hkd->hqd"}> : () -> ()
    %cst_103 = arith.constant dense<0.000000e+00> : vector<4x8x8xf32>
    %207 = tpu.matmul %206, %193, %cst_103 {dimension_numbers = #tpu.dot_dimension_numbers<[2], [1], [1], [2], [0, 0, 0, 1, 1, 2], [0], [0]>} : vector<4x8x8xf32>, vector<4x8x8xf32>, vector<4x8x8xf32> -> vector<4x8x8xf32>
    "tpu.trace_stop"() : () -> ()
    %c1_104 = arith.constant 1 : index
    %c0_105 = arith.constant 0 : index
    %c0_106 = arith.constant 0 : index
    %c0_107 = arith.constant 0 : index
    %208 = vector.load %arg10[%c1_104, %c0_105, %c0_106, %c0_107] : memref<2x4x8x32xf32, #tpu.memory_space<vmem>>, vector<1x4x8x32xf32>
    %209 = vector.shape_cast %208 : vector<1x4x8x32xf32> to vector<4x8x32xf32>
    "tpu.trace_start"() <{level = 10 : i32, message = "hsd,hdo->hso"}> : () -> ()
    %cst_108 = arith.constant dense<0.000000e+00> : vector<4x8x32xf32>
    %210 = tpu.matmul %207, %209, %cst_108 {dimension_numbers = #tpu.dot_dimension_numbers<[2], [1], [1], [2], [0, 0, 0, 1, 1, 2], [0], [0]>} : vector<4x8x8xf32>, vector<4x8x32xf32>, vector<4x8x32xf32> -> vector<4x8x32xf32>
    "tpu.trace_stop"() : () -> ()
    %cst_109 = arith.constant dense<0.000000e+00> : vector<8x32xf32>
    %211 = vector.multi_reduction <add>, %210, %cst_109 [0] : vector<4x8x32xf32> to vector<8x32xf32>
    %c1_110 = arith.constant 1 : index
    %c0_111 = arith.constant 0 : index
    %c0_112 = arith.constant 0 : index
    %212 = vector.load %arg11[%c1_110, %c0_111, %c0_112] : memref<2x1x32xf32, #tpu.memory_space<vmem>>, vector<1x1x32xf32>
    %213 = vector.shape_cast %212 : vector<1x1x32xf32> to vector<1x32xf32>
    %214 = vector.broadcast %213 : vector<1x32xf32> to vector<8x32xf32>
    %215 = arith.addf %211, %214 : vector<8x32xf32>
    %216 = arith.addf %215, %178 : vector<8x32xf32>
    %c1_113 = arith.constant 1 : index
    %c0_114 = arith.constant 0 : index
    %c0_115 = arith.constant 0 : index
    %217 = vector.load %arg12[%c1_113, %c0_114, %c0_115] : memref<2x1x32xf32, #tpu.memory_space<vmem>>, vector<1x1x32xf32>
    %218 = vector.shape_cast %217 : vector<1x1x32xf32> to vector<1x32xf32>
    %c1_116 = arith.constant 1 : index
    %c0_117 = arith.constant 0 : index
    %c0_118 = arith.constant 0 : index
    %219 = vector.load %arg13[%c1_116, %c0_117, %c0_118] : memref<2x1x32xf32, #tpu.memory_space<vmem>>, vector<1x1x32xf32>
    %220 = vector.shape_cast %219 : vector<1x1x32xf32> to vector<1x32xf32>
    %cst_119 = arith.constant dense<0.000000e+00> : vector<8xf32>
    %221 = vector.multi_reduction <add>, %216, %cst_119 [1] : vector<8x32xf32> to vector<8xf32>
    %222 = vector.shape_cast %221 : vector<8xf32> to vector<8x1xf32>
    %cst_120 = arith.constant 3.200000e+01 : f32
    %223 = vector.broadcast %cst_120 : f32 to vector<8x1xf32>
    %224 = arith.divf %222, %223 : vector<8x1xf32>
    %225 = vector.broadcast %224 : vector<8x1xf32> to vector<8x32xf32>
    %226 = arith.subf %216, %225 : vector<8x32xf32>
    %227 = arith.mulf %226, %226 : vector<8x32xf32>
    %cst_121 = arith.constant dense<0.000000e+00> : vector<8xf32>
    %228 = vector.multi_reduction <add>, %227, %cst_121 [1] : vector<8x32xf32> to vector<8xf32>
    %229 = vector.shape_cast %228 : vector<8xf32> to vector<8x1xf32>
    %cst_122 = arith.constant 3.200000e+01 : f32
    %230 = vector.broadcast %cst_122 : f32 to vector<8x1xf32>
    %231 = arith.divf %229, %230 : vector<8x1xf32>
    %cst_123 = arith.constant 9.99999974E-6 : f32
    %232 = vector.broadcast %cst_123 : f32 to vector<8x1xf32>
    %233 = arith.addf %231, %232 : vector<8x1xf32>
    %234 = math.rsqrt %233 : vector<8x1xf32>
    %235 = vector.broadcast %234 : vector<8x1xf32> to vector<8x32xf32>
    %236 = arith.mulf %226, %235 : vector<8x32xf32>
    %237 = vector.broadcast %218 : vector<1x32xf32> to vector<8x32xf32>
    %238 = arith.mulf %236, %237 : vector<8x32xf32>
    %239 = vector.broadcast %220 : vector<1x32xf32> to vector<8x32xf32>
    %240 = arith.addf %238, %239 : vector<8x32xf32>
    %c1_124 = arith.constant 1 : index
    %c0_125 = arith.constant 0 : index
    %c0_126 = arith.constant 0 : index
    %241 = vector.load %arg14[%c1_124, %c0_125, %c0_126] : memref<2x32x64xf32, #tpu.memory_space<vmem>>, vector<1x32x64xf32>
    %242 = vector.shape_cast %241 : vector<1x32x64xf32> to vector<32x64xf32>
    %cst_127 = arith.constant dense<0.000000e+00> : vector<8x64xf32>
    %243 = tpu.matmul %240, %242, %cst_127 {dimension_numbers = #tpu.dot_dimension_numbers<[1], [0], [0], [1], [0, 0, 1, 1], [], []>} : vector<8x32xf32>, vector<32x64xf32>, vector<8x64xf32> -> vector<8x64xf32>
    %c1_128 = arith.constant 1 : index
    %c0_129 = arith.constant 0 : index
    %c0_130 = arith.constant 0 : index
    %244 = vector.load %arg15[%c1_128, %c0_129, %c0_130] : memref<2x1x64xf32, #tpu.memory_space<vmem>>, vector<1x1x64xf32>
    %245 = vector.shape_cast %244 : vector<1x1x64xf32> to vector<1x64xf32>
    %246 = vector.broadcast %245 : vector<1x64xf32> to vector<8x64xf32>
    %247 = arith.addf %243, %246 : vector<8x64xf32>
    %cst_131 = arith.constant 5.000000e-01 : f32
    %248 = vector.broadcast %cst_131 : f32 to vector<8x64xf32>
    %249 = arith.mulf %248, %247 : vector<8x64xf32>
    %cst_132 = arith.constant 4.471500e-02 : f32
    %250 = vector.broadcast %cst_132 : f32 to vector<8x64xf32>
    %251 = arith.mulf %250, %247 : vector<8x64xf32>
    %252 = arith.mulf %251, %247 : vector<8x64xf32>
    %253 = arith.mulf %252, %247 : vector<8x64xf32>
    %254 = arith.addf %247, %253 : vector<8x64xf32>
    %cst_133 = arith.constant 0.797884583 : f32
    %255 = vector.broadcast %cst_133 : f32 to vector<8x64xf32>
    %256 = arith.mulf %255, %254 : vector<8x64xf32>
    %257 = math.tanh %256 : vector<8x64xf32>
    %cst_134 = arith.constant 1.000000e+00 : f32
    %258 = vector.broadcast %cst_134 : f32 to vector<8x64xf32>
    %259 = arith.addf %258, %257 : vector<8x64xf32>
    %260 = arith.mulf %249, %259 : vector<8x64xf32>
    %c1_135 = arith.constant 1 : index
    %c0_136 = arith.constant 0 : index
    %c0_137 = arith.constant 0 : index
    %261 = vector.load %arg16[%c1_135, %c0_136, %c0_137] : memref<2x64x32xf32, #tpu.memory_space<vmem>>, vector<1x64x32xf32>
    %262 = vector.shape_cast %261 : vector<1x64x32xf32> to vector<64x32xf32>
    %cst_138 = arith.constant dense<0.000000e+00> : vector<8x32xf32>
    %263 = tpu.matmul %260, %262, %cst_138 {dimension_numbers = #tpu.dot_dimension_numbers<[1], [0], [0], [1], [0, 0, 1, 1], [], []>} : vector<8x64xf32>, vector<64x32xf32>, vector<8x32xf32> -> vector<8x32xf32>
    %c1_139 = arith.constant 1 : index
    %c0_140 = arith.constant 0 : index
    %c0_141 = arith.constant 0 : index
    %264 = vector.load %arg17[%c1_139, %c0_140, %c0_141] : memref<2x1x32xf32, #tpu.memory_space<vmem>>, vector<1x1x32xf32>
    %265 = vector.shape_cast %264 : vector<1x1x32xf32> to vector<1x32xf32>
    %266 = vector.broadcast %265 : vector<1x32xf32> to vector<8x32xf32>
    %267 = arith.addf %263, %266 : vector<8x32xf32>
    %268 = arith.addf %267, %240 : vector<8x32xf32>
    %c1_142 = arith.constant 1 : index
    %c0_143 = arith.constant 0 : index
    %c0_144 = arith.constant 0 : index
    %269 = vector.load %arg18[%c1_142, %c0_143, %c0_144] : memref<2x1x32xf32, #tpu.memory_space<vmem>>, vector<1x1x32xf32>
    %270 = vector.shape_cast %269 : vector<1x1x32xf32> to vector<1x32xf32>
    %c1_145 = arith.constant 1 : index
    %c0_146 = arith.constant 0 : index
    %c0_147 = arith.constant 0 : index
    %271 = vector.load %arg19[%c1_145, %c0_146, %c0_147] : memref<2x1x32xf32, #tpu.memory_space<vmem>>, vector<1x1x32xf32>
    %272 = vector.shape_cast %271 : vector<1x1x32xf32> to vector<1x32xf32>
    %cst_148 = arith.constant dense<0.000000e+00> : vector<8xf32>
    %273 = vector.multi_reduction <add>, %268, %cst_148 [1] : vector<8x32xf32> to vector<8xf32>
    %274 = vector.shape_cast %273 : vector<8xf32> to vector<8x1xf32>
    %cst_149 = arith.constant 3.200000e+01 : f32
    %275 = vector.broadcast %cst_149 : f32 to vector<8x1xf32>
    %276 = arith.divf %274, %275 : vector<8x1xf32>
    %277 = vector.broadcast %276 : vector<8x1xf32> to vector<8x32xf32>
    %278 = arith.subf %268, %277 : vector<8x32xf32>
    %279 = arith.mulf %278, %278 : vector<8x32xf32>
    %cst_150 = arith.constant dense<0.000000e+00> : vector<8xf32>
    %280 = vector.multi_reduction <add>, %279, %cst_150 [1] : vector<8x32xf32> to vector<8xf32>
    %281 = vector.shape_cast %280 : vector<8xf32> to vector<8x1xf32>
    %cst_151 = arith.constant 3.200000e+01 : f32
    %282 = vector.broadcast %cst_151 : f32 to vector<8x1xf32>
    %283 = arith.divf %281, %282 : vector<8x1xf32>
    %cst_152 = arith.constant 9.99999974E-6 : f32
    %284 = vector.broadcast %cst_152 : f32 to vector<8x1xf32>
    %285 = arith.addf %283, %284 : vector<8x1xf32>
    %286 = math.rsqrt %285 : vector<8x1xf32>
    %287 = vector.broadcast %286 : vector<8x1xf32> to vector<8x32xf32>
    %288 = arith.mulf %278, %287 : vector<8x32xf32>
    %289 = vector.broadcast %270 : vector<1x32xf32> to vector<8x32xf32>
    %290 = arith.mulf %288, %289 : vector<8x32xf32>
    %291 = vector.broadcast %272 : vector<1x32xf32> to vector<8x32xf32>
    %292 = arith.addf %290, %291 : vector<8x32xf32>
    %293 = vector.extract_strided_slice %292 {offsets = [0, 0], sizes = [1, 32], strides = [1, 1]} : vector<8x32xf32> to vector<1x32xf32>
    %c0_153 = arith.constant 0 : index
    %c0_154 = arith.constant 0 : index
    %294 = vector.load %arg20[%c0_153, %c0_154] : memref<32x32xf32, #tpu.memory_space<vmem>>, vector<32x32xf32>
    %cst_155 = arith.constant dense<0.000000e+00> : vector<1x32xf32>
    %295 = tpu.matmul %293, %294, %cst_155 {dimension_numbers = #tpu.dot_dimension_numbers<[1], [0], [0], [1], [0, 0, 1, 1], [], []>} : vector<1x32xf32>, vector<32x32xf32>, vector<1x32xf32> -> vector<1x32xf32>
    %c0_156 = arith.constant 0 : index
    %c0_157 = arith.constant 0 : index
    %296 = vector.load %arg21[%c0_156, %c0_157] : memref<1x32xf32, #tpu.memory_space<vmem>>, vector<1x32xf32>
    %297 = arith.addf %295, %296 : vector<1x32xf32>
    %298 = math.tanh %297 : vector<1x32xf32>
    %c0_158 = arith.constant 0 : index
    %c0_159 = arith.constant 0 : index
    %c0_160 = arith.constant 0 : index
    %299 = vector.load %arg22[%c0_158, %c0_159, %c0_160] : memref<1x1x32xf32, #tpu.memory_space<vmem>>, vector<1x1x32xf32>
    %300 = vector.shape_cast %299 : vector<1x1x32xf32> to vector<1x32xf32>
    %301 = vector.shape_cast %298 : vector<1x32xf32> to vector<1x1x32xf32>
    tpu.vector_store %arg22[%c0_158, %c0_159, %c0_160], %301 {strides = array<i32>} : memref<1x1x32xf32, #tpu.memory_space<vmem>>, vector<1x1x32xf32>,
    return
  }
  func.func @transform_0(%arg0: i32) -> (i32, i32, i32) {
    %c0_i32 = arith.constant 0 : i32
    %c0_i32_0 = arith.constant 0 : i32
    %c0_i32_1 = arith.constant 0 : i32
    return %arg0, %c0_i32, %c0_i32_0 : i32, i32, i32
  }
  func.func @transform_1(%arg0: i32) -> (i32, i32, i32) {
    %c0_i32 = arith.constant 0 : i32
    %c0_i32_0 = arith.constant 0 : i32
    %c0_i32_1 = arith.constant 0 : i32
    return %arg0, %c0_i32, %c0_i32_0 : i32, i32, i32
  }
  func.func @transform_2(%arg0: i32) -> (i32, i32, i32) {
    %c0_i32 = arith.constant 0 : i32
    %c0_i32_0 = arith.constant 0 : i32
    %c0_i32_1 = arith.constant 0 : i32
    return %arg0, %c0_i32, %c0_i32_0 : i32, i32, i32
  }
  func.func @transform_3(%arg0: i32) -> (i32, i32, i32) {
    %c0_i32 = arith.constant 0 : i32
    %c0_i32_0 = arith.constant 0 : i32
    %c0_i32_1 = arith.constant 0 : i32
    return %arg0, %c0_i32, %c0_i32_0 : i32, i32, i32
  }
  func.func @transform_4(%arg0: i32) -> (i32, i32, i32) {
    %c0_i32 = arith.constant 0 : i32
    %c0_i32_0 = arith.constant 0 : i32
    %c0_i32_1 = arith.constant 0 : i32
    return %arg0, %c0_i32, %c0_i32_0 : i32, i32, i32
  }
  func.func @transform_5(%arg0: i32) -> (i32, i32) {
    %c0_i32 = arith.constant 0 : i32
    %c0_i32_0 = arith.constant 0 : i32
    %c0_i32_1 = arith.constant 0 : i32
    return %c0_i32, %c0_i32_0 : i32, i32
  }
  func.func @transform_6(%arg0: i32) -> (i32, i32) {
    %c0_i32 = arith.constant 0 : i32
    %c0_i32_0 = arith.constant 0 : i32
    %c0_i32_1 = arith.constant 0 : i32
    return %c0_i32, %c0_i32_0 : i32, i32
  }
  func.func @transform_7(%arg0: i32) -> (i32, i32, i32, i32) {
    %c0_i32 = arith.constant 0 : i32
    %c0_i32_0 = arith.constant 0 : i32
    %c0_i32_1 = arith.constant 0 : i32
    %c0_i32_2 = arith.constant 0 : i32
    %c0_i32_3 = arith.constant 0 : i32
    return %c0_i32, %c0_i32_0, %c0_i32_1, %c0_i32_2 : i32, i32, i32, i32
  }
  func.func @transform_8(%arg0: i32) -> (i32, i32, i32, i32) {
    %c0_i32 = arith.constant 0 : i32
    %c0_i32_0 = arith.constant 0 : i32
    %c0_i32_1 = arith.constant 0 : i32
    %c0_i32_2 = arith.constant 0 : i32
    %c0_i32_3 = arith.constant 0 : i32
    return %c0_i32, %c0_i32_0, %c0_i32_1, %c0_i32_2 : i32, i32, i32, i32
  }
  func.func @transform_9(%arg0: i32) -> (i32, i32, i32, i32) {
    %c0_i32 = arith.constant 0 : i32
    %c0_i32_0 = arith.constant 0 : i32
    %c0_i32_1 = arith.constant 0 : i32
    %c0_i32_2 = arith.constant 0 : i32
    %c0_i32_3 = arith.constant 0 : i32
    return %c0_i32, %c0_i32_0, %c0_i32_1, %c0_i32_2 : i32, i32, i32, i32
  }
  func.func @transform_10(%arg0: i32) -> (i32, i32, i32) {
    %c0_i32 = arith.constant 0 : i32
    %c0_i32_0 = arith.constant 0 : i32
    %c0_i32_1 = arith.constant 0 : i32
    %c0_i32_2 = arith.constant 0 : i32
    return %c0_i32, %c0_i32_0, %c0_i32_1 : i32, i32, i32
  }
  func.func @transform_11(%arg0: i32) -> (i32, i32, i32) {
    %c0_i32 = arith.constant 0 : i32
    %c0_i32_0 = arith.constant 0 : i32
    %c0_i32_1 = arith.constant 0 : i32
    %c0_i32_2 = arith.constant 0 : i32
    return %c0_i32, %c0_i32_0, %c0_i32_1 : i32, i32, i32
  }
  func.func @transform_12(%arg0: i32) -> (i32, i32, i32) {
    %c0_i32 = arith.constant 0 : i32
    %c0_i32_0 = arith.constant 0 : i32
    %c0_i32_1 = arith.constant 0 : i32
    %c0_i32_2 = arith.constant 0 : i32
    return %c0_i32, %c0_i32_0, %c0_i32_1 : i32, i32, i32
  }
  func.func @transform_13(%arg0: i32) -> (i32, i32, i32) {
    %c0_i32 = arith.constant 0 : i32
    %c0_i32_0 = arith.constant 0 : i32
    %c0_i32_1 = arith.constant 0 : i32
    %c0_i32_2 = arith.constant 0 : i32
    return %c0_i32, %c0_i32_0, %c0_i32_1 : i32, i32, i32
  }
  func.func @transform_14(%arg0: i32) -> (i32, i32, i32) {
    %c0_i32 = arith.constant 0 : i32
    %c0_i32_0 = arith.constant 0 : i32
    %c0_i32_1 = arith.constant 0 : i32
    %c0_i32_2 = arith.constant 0 : i32
    return %c0_i32, %c0_i32_0, %c0_i32_1 : i32, i32, i32
  }
  func.func @transform_15(%arg0: i32) -> (i32, i32, i32) {
    %c0_i32 = arith.constant 0 : i32
    %c0_i32_0 = arith.constant 0 : i32
    %c0_i32_1 = arith.constant 0 : i32
    %c0_i32_2 = arith.constant 0 : i32
    return %c0_i32, %c0_i32_0, %c0_i32_1 : i32, i32, i32
  }
  func.func @transform_16(%arg0: i32) -> (i32, i32, i32) {
    %c0_i32 = arith.constant 0 : i32
    %c0_i32_0 = arith.constant 0 : i32
    %c0_i32_1 = arith.constant 0 : i32
    %c0_i32_2 = arith.constant 0 : i32
    return %c0_i32, %c0_i32_0, %c0_i32_1 : i32, i32, i32
  }
  func.func @transform_17(%arg0: i32) -> (i32, i32, i32) {
    %c0_i32 = arith.constant 0 : i32
    %c0_i32_0 = arith.constant 0 : i32
    %c0_i32_1 = arith.constant 0 : i32
    %c0_i32_2 = arith.constant 0 : i32
    return %c0_i32, %c0_i32_0, %c0_i32_1 : i32, i32, i32
  }
  func.func @transform_18(%arg0: i32) -> (i32, i32, i32) {
    %c0_i32 = arith.constant 0 : i32
    %c0_i32_0 = arith.constant 0 : i32
    %c0_i32_1 = arith.constant 0 : i32
    %c0_i32_2 = arith.constant 0 : i32
    return %c0_i32, %c0_i32_0, %c0_i32_1 : i32, i32, i32
  }
  func.func @transform_19(%arg0: i32) -> (i32, i32) {
    %c0_i32 = arith.constant 0 : i32
    %c0_i32_0 = arith.constant 0 : i32
    %c0_i32_1 = arith.constant 0 : i32
    return %c0_i32, %c0_i32_0 : i32, i32
  }
  func.func @transform_20(%arg0: i32) -> (i32, i32) {
    %c0_i32 = arith.constant 0 : i32
    %c0_i32_0 = arith.constant 0 : i32
    %c0_i32_1 = arith.constant 0 : i32
    return %c0_i32, %c0_i32_0 : i32, i32
  }
  func.func @transform_21(%arg0: i32) -> (i32, i32, i32) {
    %c0_i32 = arith.constant 0 : i32
    %c0_i32_0 = arith.constant 0 : i32
    %c0_i32_1 = arith.constant 0 : i32
    return %arg0, %c0_i32, %c0_i32_0 : i32, i32, i32
  }
}

</mosaic_0001>

<bundles_post_ra>
// kernel: graphcodebert_forward.1
= control target key start
LH: loop header
LB: loop body
LE: loop exit
PB: predicated region body
PF: predicated region fallthrough
CT: control target
= control target key end

     0   :  { %s5989_s0 = inlined_call_operand.vmem [shape: s32[2,8,1], index: 0, kind: input, shape index: {}]   ;;  %s5990_s1 = inlined_call_operand.vmem [shape: s32[2,1,8], index: 1, kind: input, shape index: {}]   ;;  %s5991_s2 = inlined_call_operand.vmem [shape: f32[2,8,8], index: 2, kind: input, shape index: {}]   ;;  %s5992_s3 = inlined_call_operand.vmem [shape: f32[2,8,32], index: 3, kind: input, shape index: {}]   ;;  %s5993_s4 = inlined_call_operand.vmem [shape: f32[2,8,32], index: 4, kind: input, shape index: {}]   ;;  %s5994_s5 = inlined_call_operand.vmem [shape: f32[1,32], index: 5, kind: input, shape index: {}]   ;;  %s5995_s6 = inlined_call_operand.vmem [shape: f32[1,32], index: 6, kind: input, shape index: {}, may-alias: {6,20}]   ;;  %s5996_s7 = inlined_call_operand.vmem [shape: f32[2,4,32,24], index: 7, kind: input, shape index: {}]   ;;  %s5997_s8 = inlined_call_operand.vmem [shape: f32[2,4,1,24], index: 8, kind: input, shape index: {}]   ;;  %s5998_s9 = inlined_call_operand.hbm [shape: f32[2,4,8,32], index: 9, kind: input, shape index: {}]   ;;  %s5999_s10 = inlined_call_operand.vmem [shape: f32[2,1,32], index: 10, kind: input, shape index: {}, may-alias: {10,12,16,18}]   ;;  %s6000_s11 = inlined_call_operand.vmem [shape: f32[2,1,32], index: 11, kind: input, shape index: {}, may-alias: {11,17}]   ;;  %s6001_s12 = inlined_call_operand.vmem [shape: f32[2,1,32], index: 12, kind: input, shape index: {}, may-alias: {10,12,16,18}]   ;;  %s6002_s13 = inlined_call_operand.hbm [shape: f32[2,32,64], index: 13, kind: input, shape index: {}]   ;;  %s6003_s14 = inlined_call_operand.vmem [shape: f32[2,1,64], index: 14, kind: input, shape index: {}]   ;;  %s6004_s15 = inlined_call_operand.vmem [shape: f32[2,64,32], index: 15, kind: input, shape index: {}]   ;;  %s6005_s16 = inlined_call_operand.vmem [shape: f32[2,1,32], index: 16, kind: input, shape index: {}, may-alias: {10,12,16,18}]   ;;  %s6006_s17 = inlined_call_operand.vmem [shape: f32[2,1,32], index: 17, kind: input, shape index: {}, may-alias: {11,17}]   ;;  %s6007_s18 = inlined_call_operand.vmem [shape: f32[2,1,32], index: 18, kind: input, shape index: {}, may-alias: {10,12,16,18}]   ;;  %s6008_s19 = inlined_call_operand.hbm [shape: f32[32,32], index: 19, kind: input, shape index: {}]   ;;  %s6009_s20 = inlined_call_operand.vmem [shape: f32[1,32], index: 20, kind: input, shape index: {}, may-alias: {6,20}]   ;;  %s6010_s21 = inlined_call_operand.hbm [shape: f32[2,1,32], index: 21, kind: output, shape index: {}]  }
   0x1   :  { %6025 = sst [smem:[#allocation20_spill]] %s5989_s0 }
   0x2   :  { %6026 = sst [smem:[#allocation21_spill]] %s5990_s1 }
   0x3   :  { %6027 = sst [smem:[#allocation22_spill]] %s5991_s2 }
   0x4   :  { %6028 = sst [smem:[#allocation23_spill]] %s5992_s3 }
   0x5   :  { %6029 = sst [smem:[#allocation24_spill]] %s5993_s4 }
   0x6   :  { %6030 = sst [smem:[#allocation25_spill]] %s5994_s5 }
   0x7   :  { %6031 = sst [smem:[#allocation26_spill]] %s6007_s18 }
   0x8   :  { %6032 = sst [smem:[#allocation27_spill]] %s6009_s20 }
   0x9   :  { %6033 = sst [smem:[#allocation28_spill]] %s6010_s21 }
   0xa   :  { %26 = vsyncpa [#allocation3], 0 }
   0xb   :  { %27 = vsyncpa [#allocation6], 0 }
   0xc   :  { %28 = vsyncpa [#allocation4], 0 }
   0xd   :  { %30 = vsyncpa [#allocation4 + $0x1], 0  ;;  %s5260_s2 = smov 0   ;;  %s5262_s25 = smov 0  }
   0xe   :  { %s5264_s26 = smov 0   ;;  %s5266_s27 = smov 0  }
   0xf LB: > { %6034 = sst [smem:[#allocation12_spill]] %s5124_s2  ;;  %s5281_s3 = sadd.s32 4294967295, %s5136_s27   ;;  %s5136_s27 = sphi %s5266_s27, %s6070_s27   ;;  %s5132_s26 = sphi %s5264_s26, %s6073_s26   ;;  %s5128_s25 = sphi %s5262_s25, %s6072_s25   ;;  %s5124_s2 = sphi %s5260_s2, %s6071_s2  }
  0x10   : > { %6035 = sst [smem:[#allocation13_spill]] %s5128_s25  ;;  %s4231_s28 = sadd.s32 4294967294, %s5136_s27  }
  0x11   : > { %6036 = sst [smem:[#allocation14_spill]] %s5132_s26  ;;  %s5285_s29 = sadd.s32 1, %s5136_s27  }
  0x12   : > { %6037 = sst [smem:[#allocation15_spill]] %s5136_s27  ;;  %s509_s0 = sadd.s32 1, %s5132_s26 }
  0x13   : > { %6038 = sst [smem:[#allocation16_spill]] %s5285_s29  ;;  %s506_s4 = ssub.s32 %s5136_s27, %s5285_s29 }
  0x14   : > { %p519_p0 = scmp.ne.s32.totalorder %s5132_s26, %s5128_s25  ;;  %p507_p1 = scmp.eq.s32.totalorder %s506_s4, 0 }
  0x15   : > { %p520_p2 = scmp.eq.s32.totalorder %s5281_s3, 1  ;;  %p525_p3 = scmp.ne.s32.totalorder %s5128_s25, %s5124_s2 }
  0x16   : > { %p526_p4 = scmp.eq.s32.totalorder %s4231_s28, 1  ;;  %p4232_p7 = scmp.ge.s32.totalorder %s5136_s27, 1 }
  0x17   : > { %s5296_s30 = scalar_select %p507_p1, %s5132_s26, %s509_s0  }
  0x18   : > { %p5298_p5 = por %p520_p2, %p519_p0  ;;  %p5302_p6 = por %p526_p4, %p525_p3 }
  0x19   : > { %6039 = sst [smem:[#allocation17_spill]] %s5296_s30  ;;  %p533_p8 = scmp.lt.s32.totalorder %s5136_s27, 3 }
  0x1a   : > { %s6040_s5 = scalar_select %p5298_p5, 1, 0 }
  0x1b   : > { %s6042_s22 = scalar_select %p5302_p6, 1, 0 }
  0x1c   : > { %6041 = sst [smem:[#allocation18_spill]] %s6040_s5  ;;  %p6018_p9 = scmp.eq.s32.totalorder %s5281_s3, 0 }
  0x1d   : > { %6043 = sst [smem:[#allocation19_spill]] %s6042_s22  ;;  %p5309_p10 = pnand %p4232_p7, %p533_p8 }
  0x1e   : > { %s5138_s1 = smov [#allocation5]   ;;  %s5139_s0 = smov [#allocation2]  }
  0x1f   : > { %s6044_s23 = scalar_select %p5309_p10, 1, 0 }
  0x20   : > { %p4866_p11 = pneg %p5309_p10  ;;  %s579_s24 = sshll.u32 %s5138_s1, 4  ;;  %s5315_s24 = int_to_ptr.vmem [resolvable:$true] %s579_s24 }
  0x21   : > { %s557_s4 = sshll.u32 %s5139_s0, 4  ;;  %s5140_s30 = smov [#allocation7]   ;;  %s5323_s4 = int_to_ptr.vmem [resolvable:$true] %s557_s4 }
  0x22   : > { %p5319_p12 = pnand %p6018_p9, %p4866_p11  ;;  %s5325_s26 = sshll.u32 %s5140_s30, 4  ;;  %s608_s26 = int_to_ptr.vmem [resolvable:$true] %s5325_s26 }
  0x23   : > { %s4982_s2 = scalar_lea.hbm %s6002_s13, 1024 }
  0x24   : > { %p4983_p13 = scmp.ne.s32.totalorder %s6002_s13, %s4982_s2  ;;  %p5335_p0 = pneg %p5319_p12 }
  0x25   : > { %p4989_p3 = scmp.lt.u32.totalorder %s4982_s2, %s6002_s13 }
  0x26   : > { %p4985_p1 = pnand %p5335_p0, %p4983_p13 }
  0x28   : > { %p4986_p2 = pneg %p4985_p1 }
  0x2a   : > { %p4991_p4 = pnand %p4989_p3, %p4986_p2 }
  0x2c   : > { %4994 = shalt.err (!%p4991_p4)
}
  0x2d   : > { %s4995_s27 = scalar_lea.vmem %s5315_s24, 1024  ;;  %p5003_p9 = scmp.lt.s32.totalorder %s5315_s24, %s5315_s24 }
  0x2e   : > { %p4996_p7 = scmp.ne.s32.totalorder %s5315_s24, %s4995_s27  ;;  %p5004_p6 = scmp.lt.s32.totalorder %s4995_s27, %s4995_s27 }
  0x30   : > { %p4998_p8 = pnand %p4996_p7, %p5335_p0  ;;  %p5005_p13 = por %p5004_p6, %p5003_p9 }
  0x32   : > { %p4999_p11 = pneg %p4998_p8 }
  0x34   : > { %p5006_p1 = pnand %p5005_p13, %p4999_p11 }
  0x36   : > { %5009 = shalt.err (!%p5006_p1)
}
  0x37   : > { %s5141_s29 = smov 128   ;;  %s5142_s2 = smov 8  }
  0x38   : > { %4872 = dma.hbm_to_vmem [thread:$0]  (!%p5319_p12), %s6002_s13, 1024, %s5315_s24, [#allocation6], %s5141_s29, %s5141_s29, %s5142_s2  }
  0x39   : > { %s5010_s27 = scalar_lea.hbm %s5998_s9, 1024 }
  0x3a   : > { %p5011_p6 = scmp.ne.s32.totalorder %s5998_s9, %s5010_s27  ;;  %p5017_p3 = scmp.lt.u32.totalorder %s5010_s27, %s5998_s9 }
  0x3c   : > { %p5013_p9 = pnand %p5011_p6, %p5335_p0 }
  0x3e   : > { %p5014_p2 = pneg %p5013_p9 }
  0x40   : > { %p5019_p4 = pnand %p5017_p3, %p5014_p2 }
  0x42   : > { %5022 = shalt.err (!%p5019_p4)
}
  0x43   : > { %s5023_s24 = scalar_lea.vmem %s5323_s4, 1024  ;;  %p5031_p13 = scmp.lt.s32.totalorder %s5323_s4, %s5323_s4 }
  0x44   : > { %p5024_p7 = scmp.ne.s32.totalorder %s5323_s4, %s5023_s24  ;;  %p5032_p1 = scmp.lt.s32.totalorder %s5023_s24, %s5023_s24 }
  0x46   : > { %p5026_p8 = pnand %p5024_p7, %p5335_p0  ;;  %p5033_p6 = por %p5032_p1, %p5031_p13 }
  0x48   : > { %p5027_p11 = pneg %p5026_p8 }
  0x4a   : > { %p5034_p9 = pnand %p5033_p6, %p5027_p11 }
  0x4c   : > { %5037 = shalt.err (!%p5034_p9)
}
  0x4d   : > { %4869 = dma.hbm_to_vmem [thread:$0]  (!%p5319_p12), %s5998_s9, 1024, %s5323_s4, [#allocation3], %s5141_s29, %s5141_s29, %s5142_s2  }
  0x4e   : > { %s5038_s22 = scalar_lea.hbm %s6008_s19, 512 }
  0x4f   : > { %p5039_p2 = scmp.ne.s32.totalorder %s6008_s19, %s5038_s22  ;;  %p5045_p7 = scmp.lt.u32.totalorder %s5038_s22, %s6008_s19 }
  0x51   : > { %p5041_p3 = pnand %p5039_p2, %p5335_p0 }
  0x53   : > { %p5042_p4 = pneg %p5041_p3 }
  0x55   : > { %p5047_p8 = pnand %p5045_p7, %p5042_p4 }
  0x57   : > { %5050 = shalt.err (!%p5047_p8)
}
  0x58   : > { %s5051_s24 = scalar_lea.vmem %s608_s26, 512  ;;  %p5059_p6 = scmp.lt.s32.totalorder %s608_s26, %s608_s26 }
  0x59   : > { %p5052_p11 = scmp.ne.s32.totalorder %s608_s26, %s5051_s24  ;;  %p5060_p9 = scmp.lt.s32.totalorder %s5051_s24, %s5051_s24 }
  0x5b   : > { %p5054_p13 = pnand %p5052_p11, %p5335_p0  ;;  %p5061_p5 = por %p5060_p9, %p5059_p6 }
  0x5d   : > { %p5055_p1 = pneg %p5054_p13 }
  0x5f   : > { %p5062_p10 = pnand %p5061_p5, %p5055_p1 }
  0x61   : > { %5065 = shalt.err (!%p5062_p10)
}
  0x62   : > { %4875 = dma.hbm_to_vmem [thread:$0]  (!%p5319_p12), %s6008_s19, 512, %s608_s26, [#allocation6], %s5141_s29, %s5141_s29, %s5142_s2  }
  0x63   : > { %p6047_p2 = scmp.ne.s32.totalorder %s6044_s23, 0 }
  0x64   : > { %p6048_p0 = scmp.eq.s32.totalorder (!%p6047_p2), %s5281_s3, 0 }
  0x65   : > { %660 = sbr.rel (%p6047_p2) target bundleno = 5953 (0x1741), region = 104 }
  0x6c   : > { %5111 = dma.done.wait (%p6048_p0), [#allocation3], 1024   ;;  %p6049_p3 = pmov %p6048_p0 }
  0x6d   : > { %p6050_p5 = pmov %p6048_p0 }
  0x6e   : > { %5113 = vsyncadd (%p6049_p3), [#allocation3], 4294966272 }
  0x6f   : > { %5115 = dma.done.wait (%p6050_p5), [#allocation6], 1536   ;;  %p6051_p10 = pmov %p6048_p0 }
  0x70   : > { %p741_p4 = scmp.lt.s32.totalorder %s5281_s3, 1  ;;  %v5143_v0 = vmov 0   ;;  %v5144_v1 = vmov 0.0   ;;  %s6052_s29 = sld [smem:[#allocation20_spill]]  ;;  %v776_v4 = vlaneseq  ;;  %vm783_vm2 = vcmask 64512   ;;  %v907_v35 = vld [vmem:[%s5996_s7] sm:$0xff] }
  0x71   : > { %5117 = vsyncadd (%p6051_p10), [#allocation6], 4294965760  ;;  %4930 = vset.pattern.permute.xlu0 %v5143_v0  ;;  %4478 = vmatprep.subr.mxu0 %v5144_v1  ;;  %s6053_s5 = sld [smem:[#allocation21_spill]]  ;;  %s6054_s30 = sld [smem:[#allocation22_spill]]  ;;  %vm5145_vm3 = vmmov 0   ;;  %vm876_vm4 = vcmask 261120  }
  0x72   : > { %s742_s21 = scalar_select %p741_p4, %s5281_s3, 1  ;;  %4931 = vset.pattern.permute.xlu1 %v5143_v0  ;;  %v777_v6 = vshrl.u32 %v776_v4, 7  ;;  %4480 = vmatprep.mubr.msk.f32.mxu0 %vm5145_vm3, %v5144_v1  ;;  %v908_v36 = vld [vmem:[%s5996_s7 + $0x8] sm:$0xff]  ;;  %v911_v37 = vld [vmem:[%s5996_s7 + $0x20] sm:$0xff]  ;;  %v5146_v40 = vmov 0.0|0.0   ;;  %v909_v42 = vld [vmem:[%s5996_s7 + $0x10] sm:$0xff] }
  0x73   : > { %s6055_s18 = sld [smem:[#allocation23_spill]]  ;;  %4491 = vmatprep.mubr.msk.f32.mxu1 %vm5145_vm3, %v5144_v1  ;;  %v4763_v38 = vpack.c.bf16 %v908_v36, %v907_v35  ;;  %v912_v39 = vld [vmem:[%s5996_s7 + $0x28] sm:$0xff]  ;;  %4762 = vmatprep.subr.bf16.mxu1 %v5146_v40  ;;  %v910_v43 = vld [vmem:[%s5996_s7 + $0x18] sm:$0xff]  ;;  %v913_v44 = vld [vmem:[%s5996_s7 + $0x30] sm:$0xff]  ;;  %s6057_s25 = sld [smem:[#allocation25_spill]]  ;;  %vm2347_vm5 = vcmask 523264  }
  0x74   : > { %s5420_s26 = sshll.u32 %s742_s21, 3  ;;  %v778_v7 = vsub.s32 0, %v777_v6  ;;  %v4769_v41 = vpack.c.bf16 %v912_v39, %v911_v37  ;;  %v4766_v45 = vpack.c.bf16 %v910_v43, %v909_v42  ;;  %v914_v46 = vld [vmem:[%s5996_s7 + $0x38] sm:$0xff]  ;;  %v915_v53 = vld [vmem:[%s5996_s7 + $0x40] sm:$0xff]  ;;  %v916_v55 = vld [vmem:[%s5996_s7 + $0x48] sm:$0xff]  ;;  %s6062_s4 = sld [smem:[#allocation18_spill]] }
  0x75   : > { %4764 = vmatpush3.bf16.msra.mxu1 %v4763_v38  ;;  %v4772_v47 = vpack.c.bf16 %v914_v46, %v913_v44  ;;  %v919_v56 = vld [vmem:[%s5996_s7 + $0x60] sm:$0xff]  ;;  %v920_v57 = vld [vmem:[%s5996_s7 + $0x68] sm:$0xff]  ;;  %v4775_v60 = vpack.c.bf16 %v916_v55, %v915_v53  ;;  %v917_v62 = vld [vmem:[%s5996_s7 + $0x50] sm:$0xff]  ;;  %s4352_s23 = sshll.u32 %s5281_s3, 4  ;;  %vm4085_vm6 = vcmask 253952   ;;  %s5149_s3 = smov [#allocation8]  }
  0x76   : > { %s744_s2 = scalar_lea.vmem %s6052_s29, %s5420_s26  ;;  %s6056_s29 = sld [smem:[#allocation24_spill]]  ;;  %4765 = vmatprep.subr.bf16.mxu1 %v5146_v40  ;;  %v4249_v58 = vld [vmem:[%s5995_s6] ss:$0 sm:$0xff]  ;;  %v4781_v61 = vpack.c.bf16 %v920_v57, %v919_v56  ;;  %v918_v0 = vld [vmem:[%s5996_s7 + $0x58] sm:$0xff] }
  0x77   : > { %v760_v2 = vld [vmem:[%s744_s2] sm:$0xff]  ;;  %s747_s22 = scalar_lea.vmem %s6053_s5, %s742_s21  ;;  %s751_s27 = scalar_lea.vmem %s6054_s30, %s5420_s26  ;;  %v4778_v4 = vpack.c.bf16 %v918_v0, %v917_v62 }
  0x78   : > { %vm764_vm0 = vcmp.eq.s32.totalorder %v760_v2, 0  ;;  %v761_v5 = vld [vmem:[%s747_s22] sm:$0x1]  ;;  %v921_v2 = vld [vmem:[%s5996_s7 + $0x70] sm:$0xff]  ;;  %s5147_s30 = smov 120  }
  0x79   : > { %v4245_v3 = vsel %vm764_vm0, 1.0, %v5144_v1  ;;  %vm767_vm1 = vcmp.ge.s32.totalorder %v761_v5, 2  ;;  %v5435_v11 = vld [vmem:[%s751_s27] sm:$0xff]  ;;  %s755_s21 = scalar_lea.vmem %s6055_s18, %s5420_s26  ;;  %4767 = vmatpush3.bf16.msra.mxu1 %v4766_v45 }
  0x7a   : > { %772 = vperm.xlu0 %4930, %v4245_v3   ;;  %v4246_v8 = vsel %vm767_vm1, 1.0, %v5144_v1  ;;  %v763_v15 = vld [vmem:[%s755_s21] sm:$0xff]  ;;  %v863_v16 = vsub.f32 1.0, %v4245_v3  ;;  %4774 = vmatprep.subr.bf16.mxu1 %v5146_v40  ;;  %v922_v3 = vld [vmem:[%s5996_s7 + $0x78] sm:$0xff]  ;;  %s5148_s21 = smov 112   ;;  %p6065_p7 = scmp.ne.s32.totalorder %s6062_s4, 0 }
  0x7b   : > { %v779_v9 = vrot.slane %v4246_v8, %v778_v7  ;;  %4479 = vmatpush3.msra.mxu0 %v763_v15  ;;  %v4248_v52 = vld [vmem:[%s6057_s25] ss:$0 sm:$0xff]  ;;  %v4784_v5 = vpack.c.bf16 %v922_v3, %v921_v2  ;;  %v4251_v7 = vld [vmem:[%s5997_s8 + $0x1] ss:$0 sm:$0xff]  ;;  %s6058_s25 = sld [smem:[#allocation26_spill]] }
  0x7c   : > { %866 = vperm.xlu1 %4931, %v863_v16   ;;  %s759_s2 = scalar_lea.vmem %s6056_s29, %s5420_s26  ;;  %4768 = vmatprep.subr.bf16.mxu0 %v5146_v40  ;;  %v4250_v6 = vld [vmem:[%s5997_s8] ss:$0 sm:$0xff]  ;;  %v4253_v16 = vld [vmem:[%s5997_s8 + $0x3] ss:$0 sm:$0xff]  ;;  %s6060_s26 = sld [smem:[#allocation13_spill]] }
  0x7d   : > { %v872_v26 = vld [vmem:[%s759_s2] sm:$0xff] }
  0x81   : > { %s6059_s5 = smov %s6058_s25 }
  0x82   : > { %s739_s18 = sand.u32 1, %s6060_s26   ;;  %s5070_s26 = sshll.u32 %s5149_s3, 4  ;;  %s5071_s26 = int_to_ptr.vmem [resolvable:$false] %s5070_s26 }
  0x83   : > { %s740_s28 = scalar_lea.vmem [#allocation8], %s739_s18  ;;  %s4088_s0 = scalar_lea.sflag [#allocation4], %s739_s18 }
  0x84   : > { %s4100_s29 = sshll.u32 %s740_s28, 4  ;;  %s5072_s24 = scalar_lea.vmem %s5071_s26, 32  ;;  %s5949_s29 = int_to_ptr.vmem [resolvable:$true] %s4100_s29 }
  0x85   : > { %s5066_s27 = scalar_lea.vmem %s5949_s29, 16  ;;  %p5073_p13 = scmp.lt.s32.totalorder %s5949_s29, %s5071_s26 }
  0x86   : > { %p5067_p12 = scmp.ne.s32.totalorder %s5949_s29, %s5066_s27  ;;  %p5074_p1 = scmp.lt.s32.totalorder %s5072_s24, %s5066_s27 }
  0x88   : > { %p5068_p8 = pnand %p5067_p12, %p6065_p7  ;;  %p5075_p6 = por %p5074_p1, %p5073_p13 }
  0x8a   : > { %p5069_p11 = pneg %p5068_p8 }
  0x8c   : > { %p5076_p9 = pnand %p5075_p6, %p5069_p11 }
  0xf9   : > { %v773_v10 = vpop.permute.xlu0 %772 }
  0xfa   : > { %v781_v12 = vmul.f32 %v779_v9, %v773_v10 }
  0xfb   : > { %v867_v21 = vpop.permute.xlu1 %866 }
  0xfc   : > { %v782_v13 = vmul.f32 %v781_v12, %v5435_v11  ;;  %v869_v22 = vmul.f32 %v867_v21, %v763_v15  ;;  %v4252_v15 = vld [vmem:[%s5997_s8 + $0x2] ss:$0 sm:$0xff] }
  0xfe   : > { %v784_v14 = vsel %vm783_vm2, %v782_v13, 0.0 }
  0xff   : > { %785 = vadd.xlane.f32.xlu0 %v784_v14 }
 0x18c   : > { %v786_v17 = vpop.xlane.xlu0 %785 }
 0x18d   : > { %v787_v18 = vadd.f32 1e-10, %v786_v17 }
 0x18f   : > { %4932 = vrcp.f32 %v787_v18 }
 0x199   : > { %v4933_v19 = vpop.eup %4932 }
 0x19a   : > { %v789_v20 = vmul.f32 %v4933_v19, %v782_v13 }
 0x19c   : > { %4481 = vmatmul.mubr.msk.f32.vlgmr.msra.gmra.mrb[0].mxu0 %vm783_vm2, %v789_v20 }
 0x19d   : > { %4502 = vmatprep.mubr.msk.f32.mxu0 %vm5145_vm3, %v5144_v1  ;;  %4770 = vmatpush3.bf16.msra.mxu0 %v4769_v41 }
 0x19e   : > { %4771 = vmatprep.subr.bf16.mxu0 %v5146_v40 }
 0x1a1   : > { %4773 = vmatpush3.bf16.msra.mxu0 %v4772_v47 }
 0x1a2   : > { %4780 = vmatprep.subr.bf16.mxu0 %v5146_v40 }
 0x26f   : > { %v859_v23 = vpop.f32.mrb[0].mxu0 }
 0x270   : > { %v870_v24 = vmul.f32 %v859_v23, %v773_v10  ;;  %v4482_v25 = vpop.f32.mrb[1].mxu0 }
 0x272   : > { %v871_v27 = vadd.f32 %v870_v24, %v869_v22 }
 0x274   : > { %v873_v28 = vadd.f32 %v872_v26, %v871_v27 }
 0x276   : > { %v877_v29 = vsel %vm876_vm4, %v873_v28, 0.0 }
 0x277   : > { %878 = vadd.xlane.f32.xlu1 %v877_v29 }
 0x304   : > { %v879_v30 = vpop.xlane.xlu1 %878 }
 0x305   : > { %v881_v31 = vmul.f32 0.03125, %v879_v30 }
 0x307   : > { %v882_v32 = vsub.f32 %v873_v28, %v881_v31  ;;  %v905_v31 = vsub.f32 1.0, %v5435_v11 }
 0x309   : > { %v883_v33 = vmul.f32 %v882_v32, %v882_v32 }
 0x30b   : > { %v884_v34 = vsel %vm876_vm4, %v883_v33, 0.0 }
 0x30c   : > { %885 = vadd.xlane.f32.xlu0 %v884_v34 }
 0x399   : > { %v886_v48 = vpop.xlane.xlu0 %885 }
 0x39a   : > { %v887_v49 = vmul.f32 0.03125, %v886_v48 }
 0x39c   : > { %v888_v50 = vadd.f32 1e-05, %v887_v49 }
 0x39e   : > { %4934 = vrsqrt.f32 %v888_v50 }
 0x3a8   : > { %v4935_v51 = vpop.eup %4934 }
 0x3a9   : > { %v890_v54 = vmul.f32 %v4935_v51, %v882_v32  ;;  %v5587_v32 = vmul.f32 -1e+09, %v905_v31 }
 0x3ab   : > { %v897_v59 = vmul.f32 %v4248_v52, %v890_v54 }
 0x3ad   : > { %v5507_v63 = vadd.f32 %v4249_v58, %v897_v59 }
 0x3af   : > { %4492 = vmatmul.mubr.msk.f32.vlgmr.msra.gmra.mrb[0].mxu1 %vm876_vm4, %v5507_v63  ;;  %4503 = vmatmul.mubr.msk.f32.vlgmr.msra.gmra.mrb[2].mxu0 %vm876_vm4, %v5507_v63 }
 0x3b0   : > { %4776 = vmatpush3.bf16.msra.mxu1 %v4775_v60  ;;  %4782 = vmatpush3.bf16.msra.mxu0 %v4781_v61 }
 0x3b1   : > { %4777 = vmatprep.subr.bf16.mxu1 %v5146_v40  ;;  %4783 = vmatprep.subr.bf16.mxu0 %v5146_v40 }
 0x3b2   : > { %4513 = vmatprep.mubr.msk.f32.mxu1 %vm5145_vm3, %v5144_v1  ;;  %4524 = vmatprep.mubr.msk.f32.mxu0 %vm5145_vm3, %v5144_v1 }
 0x3b4   : > { %4779 = vmatpush3.bf16.msra.mxu1 %v4778_v4  ;;  %4785 = vmatpush3.bf16.msra.mxu0 %v4784_v5 }
 0x3b5   : > { %4532 = vmatprep.subr.mxu0 %v5144_v1  ;;  %4527 = vmatprep.subr.mxu1 %v5144_v1 }
 0x3b7   : > { %4514 = vmatmul.mubr.msk.f32.vlgmr.msra.gmra.mrb[2].mxu1 %vm876_vm4, %v5507_v63  ;;  %4525 = vmatmul.mubr.msk.f32.vlgmr.msra.gmra.mrb[4].mxu0 %vm876_vm4, %v5507_v63 }
 0x3b8   : > { %4529 = vmatprep.mubr.msk.f32.mxu1 %vm5145_vm3, %v5144_v1  ;;  %4534 = vmatprep.mubr.msk.f32.mxu0 %vm5145_vm3, %v5144_v1 }
 0x482   : > { %v1020_v8 = vpop.f32.mrb[0].mxu1  ;;  %v1090_v9 = vpop.f32.mrb[2].mxu0 }
 0x483   : > { %v5544_v10 = vadd.f32 %v4250_v6, %v1020_v8  ;;  %v1091_v12 = vadd.f32 %v4251_v7, %v1090_v9  ;;  %v4493_v13 = vpop.f32.mrb[1].mxu1  ;;  %v4504_v14 = vpop.f32.mrb[3].mxu0 }
 0x485   : > { %1317 = vrot.lane.b32.xlu1 %v1091_v12, %s5147_s30  ;;  %1239 = vrot.lane.b32.xlu0 %v5544_v10, %s5147_s30  ;;  %v1234_v25 = vmul.f32 0.35355338, %v5544_v10  ;;  %v1235_v26 = vmul.f32 0.35355338, %v1091_v12 }
 0x48a   : > { %v1160_v17 = vpop.f32.mrb[2].mxu1  ;;  %v1230_v18 = vpop.f32.mrb[4].mxu0 }
 0x48b   : > { %v5555_v19 = vadd.f32 %v4252_v15, %v1160_v17  ;;  %v5557_v20 = vadd.f32 %v4253_v16, %v1230_v18  ;;  %v4515_v21 = vpop.f32.mrb[3].mxu1  ;;  %v4526_v22 = vpop.f32.mrb[5].mxu0 }
 0x48d   : > { %1473 = vrot.lane.b32.xlu0 %v5557_v20, %s5147_s30  ;;  %1395 = vrot.lane.b32.xlu1 %v5555_v19, %s5147_s30  ;;  %v1236_v29 = vmul.f32 0.35355338, %v5555_v19  ;;  %v1237_v30 = vmul.f32 0.35355338, %v5557_v20 }
 0x4f7   : > { %v1318_v23 = vpop.permute.xlu1 %1317  ;;  %v1240_v24 = vpop.permute.xlu0 %1239 }
 0x4f8   : > { %4528 = vmatpush3.xpose.msk.msra.mxu1 %vm783_vm2, %v1240_v24  ;;  %4533 = vmatpush3.xpose.msk.msra.mxu0 %vm783_vm2, %v1318_v23  ;;  %v1898_v24 = vld [vmem:[#allocation2] sm:$0xff] }
 0x4f9   : > { %4537 = vmatprep.subr.mxu1 %v5144_v1  ;;  %4542 = vmatprep.subr.mxu0 %v5144_v1 }
 0x4fb   : > { %4530 = vmatmul.mubr.msk.f32.vlgmr.msra.gmra.mrb[4].mxu1 %vm783_vm2, %v1234_v25  ;;  %4535 = vmatmul.mubr.msk.f32.vlgmr.msra.gmra.mrb[6].mxu0 %vm783_vm2, %v1235_v26  ;;  %v1899_v25 = vld [vmem:[#allocation2 + $0x8] sm:$0xff]  ;;  %v1901_v26 = vld [vmem:[#allocation2 + $0x18] sm:$0xff] }
 0x4fc   : > { %4539 = vmatprep.mubr.msk.f32.mxu1 %vm5145_vm3, %v5144_v1  ;;  %4544 = vmatprep.mubr.msk.f32.mxu0 %vm5145_vm3, %v5144_v1 }
 0x4ff   : > { %v1474_v27 = vpop.permute.xlu0 %1473  ;;  %v1396_v28 = vpop.permute.xlu1 %1395 }
 0x500   : > { %4538 = vmatpush3.xpose.msk.msra.mxu1 %vm783_vm2, %v1396_v28  ;;  %4543 = vmatpush3.xpose.msk.msra.mxu0 %vm783_vm2, %v1474_v27  ;;  %v1900_v28 = vld [vmem:[#allocation2 + $0x10] sm:$0xff] }
 0x501   : > { %4547 = vmatprep.subr.mxu1 %v5144_v1  ;;  %4552 = vmatprep.subr.mxu0 %v5144_v1 }
 0x503   : > { %4540 = vmatmul.mubr.msk.f32.vlgmr.msra.gmra.mrb[6].mxu1 %vm783_vm2, %v1236_v29  ;;  %4545 = vmatmul.mubr.msk.f32.vlgmr.msra.gmra.mrb[8].mxu0 %vm783_vm2, %v1237_v30 }
 0x504   : > { %4549 = vmatprep.mubr.msk.f32.mxu1 %vm5145_vm3, %v5144_v1  ;;  %4554 = vmatprep.mubr.msk.f32.mxu0 %vm5145_vm3, %v5144_v1 }
 0x5ce   : > { %v1312_v33 = vpop.f32.mrb[4].mxu1  ;;  %v1390_v34 = vpop.f32.mrb[6].mxu0 }
 0x5cf   : > { %v1313_v35 = vadd.f32 %v1312_v33, %v5587_v32  ;;  %v1391_v36 = vadd.f32 %v1390_v34, %v5587_v32  ;;  %v4531_v37 = vpop.f32.mrb[5].mxu1  ;;  %v4536_v38 = vpop.f32.mrb[7].mxu0 }
 0x5d1   : > { %v1553_v39 = vsel %vm783_vm2, %v1391_v36, -inf  ;;  %v1550_v41 = vsel %vm783_vm2, %v1313_v35, -inf }
 0x5d2   : > { %1554 = vmax.xlane.f32.xlu0 %v1553_v39  ;;  %1551 = vmax.xlane.f32.xlu1 %v1550_v41 }
 0x5d6   : > { %v1468_v42 = vpop.f32.mrb[6].mxu1  ;;  %v1546_v43 = vpop.f32.mrb[8].mxu0 }
 0x5d7   : > { %v1469_v11 = vadd.f32 %v1468_v42, %v5587_v32  ;;  %v1547_v44 = vadd.f32 %v1546_v43, %v5587_v32  ;;  %v4541_v45 = vpop.f32.mrb[7].mxu1  ;;  %v4546_v46 = vpop.f32.mrb[9].mxu0 }
 0x5d9   : > { %v1559_v47 = vsel %vm783_vm2, %v1547_v44, -inf  ;;  %v1556_v48 = vsel %vm783_vm2, %v1469_v11, -inf }
 0x5da   : > { %1560 = vmax.xlane.f32.xlu1 %v1559_v47  ;;  %1557 = vmax.xlane.f32.xlu0 %v1556_v48 }
 0x5eb   : > { %1670 = vrot.lane.b32.xlu1 %v1091_v12, %s5148_s21 }
 0x5f0   : > { %1594 = vrot.lane.b32.xlu0 %v5544_v10, %s5148_s21 }
 0x65f   : > { %v1555_v49 = vpop.xlane.xlu0 %1554  ;;  %v1552_v50 = vpop.xlane.xlu1 %1551 }
 0x660   : > { %v1563_v51 = vsub.f32 %v1391_v36, %v1555_v49  ;;  %v1562_v52 = vsub.f32 %v1313_v35, %v1552_v50 }
 0x662   : > { %v1568_v53 = vmul.f32 1.442695, %v1563_v51  ;;  %v1566_v54 = vmul.f32 1.442695, %v1562_v52  ;;  %v4274_v51 = vld [vmem:[%s5999_s10] ss:$0 sm:$0xff] }
 0x664   : > { %4936 = vpow2.f32 %v1568_v53 }
 0x665   : > { %4938 = vpow2.f32 %v1566_v54 }
 0x667   : > { %v1561_v55 = vpop.xlane.xlu1 %1560  ;;  %v1558_v56 = vpop.xlane.xlu0 %1557 }
 0x668   : > { %v1565_v57 = vsub.f32 %v1547_v44, %v1561_v55  ;;  %v1564_v58 = vsub.f32 %v1469_v11, %v1558_v56 }
 0x66a   : > { %v1572_v59 = vmul.f32 1.442695, %v1565_v57  ;;  %v1570_v60 = vmul.f32 1.442695, %v1564_v58 }
 0x66b   : > { %v1671_v61 = vpop.permute.xlu1 %1670  ;;  %v1595_v62 = vpop.permute.xlu0 %1594 }
 0x66c   : > { %4940 = vpow2.f32 %v1572_v59  ;;  %4548 = vmatpush3.msra.mxu1 %v1595_v62  ;;  %4553 = vmatpush3.msra.mxu0 %v1671_v61  ;;  %v2239_v61 = vld [vmem:[#allocation5] sm:$0xff]  ;;  %v2240_v62 = vld [vmem:[#allocation5 + $0x8] sm:$0xff] }
 0x66d   : > { %4942 = vpow2.f32 %v1570_v60  ;;  %4557 = vmatprep.subr.mxu1 %v5144_v1  ;;  %4562 = vmatprep.subr.mxu0 %v5144_v1 }
 0x66e   : > { %v4937_v0 = vpop.eup %4936 }
 0x66f   : > { %v4939_v2 = vpop.eup %4938  ;;  %v1577_v3 = vsel %vm783_vm2, %v4937_v0, 0.0 }
 0x670   : > { %1578 = vadd.xlane.f32.xlu1 %v1577_v3  ;;  %v1574_v4 = vsel %vm783_vm2, %v4939_v2, 0.0  ;;  %v2242_v3 = vld [vmem:[#allocation5 + $0x18] sm:$0xff] }
 0x671   : > { %1575 = vadd.xlane.f32.xlu0 %v1574_v4 }
 0x676   : > { %v4941_v5 = vpop.eup %4940 }
 0x677   : > { %v4943_v6 = vpop.eup %4942  ;;  %v1583_v7 = vsel %vm783_vm2, %v4941_v5, 0.0 }
 0x678   : > { %1584 = vadd.xlane.f32.xlu1 %v1583_v7  ;;  %v1580_v8 = vsel %vm783_vm2, %v4943_v6, 0.0 }
 0x679   : > { %1581 = vadd.xlane.f32.xlu0 %v1580_v8  ;;  %v4275_v8 = vld [vmem:[%s6000_s11] ss:$0 sm:$0xff] }
 0x689   : > { %1746 = vrot.lane.b32.xlu1 %v5555_v19, %s5148_s21 }
 0x68f   : > { %1822 = vrot.lane.b32.xlu0 %v5557_v20, %s5148_s21 }
 0x6fd   : > { %v1579_v9 = vpop.xlane.xlu1 %1578 }
 0x6fe   : > { %4944 = vrcp.f32 %v1579_v9  ;;  %v1576_v10 = vpop.xlane.xlu0 %1575 }
 0x6ff   : > { %4946 = vrcp.f32 %v1576_v10  ;;  %v4276_v10 = vld [vmem:[%s6001_s12] ss:$0 sm:$0xff] }
 0x705   : > { %v1585_v12 = vpop.xlane.xlu1 %1584 }
 0x706   : > { %4948 = vrcp.f32 %v1585_v12  ;;  %v1582_v13 = vpop.xlane.xlu0 %1581 }
 0x707   : > { %4950 = vrcp.f32 %v1582_v13 }
 0x708   : > { %v4945_v14 = vpop.eup %4944 }
 0x709   : > { %v4947_v15 = vpop.eup %4946  ;;  %v1591_v16 = vmul.f32 %v4945_v14, %v4937_v0  ;;  %v1747_v21 = vpop.permute.xlu1 %1746  ;;  %v4787_v0 = vpack.c.bf16 %v2240_v62, %v2239_v61  ;;  %v2332_v14 = vld [vmem:[%s6004_s15] sm:$0xff]  ;;  %v4294_v61 = vld [vmem:[%s5996_s7 + $0xd8] sm:$0xff] }
 0x70a   : > { %v1590_v17 = vmul.f32 %v4947_v15, %v4939_v2  ;;  %v1823_v18 = vpop.permute.xlu0 %1822  ;;  %v2241_v2 = vld [vmem:[#allocation5 + $0x10] sm:$0xff]  ;;  %v2333_v15 = vld [vmem:[%s6004_s15 + $0x8] sm:$0xff] }
 0x70b   : > { %4555 = vmatmul.mubr.msk.f32.vlgmr.msra.gmra.mrb[10].mxu0 %vm783_vm2, %v1591_v16  ;;  %v4790_v4 = vpack.c.bf16 %v2242_v3, %v2241_v2  ;;  %v4793_v16 = vpack.c.bf16 %v2333_v15, %v2332_v14  ;;  %v4290_v14 = vld [vmem:[%s5996_s7 + $0xb8] sm:$0xff] }
 0x70c   : > { %4550 = vmatmul.mubr.msk.f32.vlgmr.msra.gmra.mrb[8].mxu1 %vm783_vm2, %v1590_v17  ;;  %4563 = vmatpush3.msra.mxu0 %v1823_v18  ;;  %v2334_v17 = vld [vmem:[%s6004_s15 + $0x10] sm:$0xff]  ;;  %v2335_v18 = vld [vmem:[%s6004_s15 + $0x18] sm:$0xff] }
 0x70d   : > { %4558 = vmatpush3.msra.mxu1 %v1747_v21  ;;  %4559 = vmatprep.mubr.msk.f32.mxu1 %vm5145_vm3, %v5144_v1  ;;  %v4796_v21 = vpack.c.bf16 %v2335_v18, %v2334_v17  ;;  %v4296_v17 = vld [vmem:[%s5996_s7 + $0xe8] sm:$0xff] }
 0x70e   : > { %4564 = vmatprep.mubr.msk.f32.mxu0 %vm5145_vm3, %v5144_v1  ;;  %4567 = vmatprep.subr.mxu1 %v5144_v1 }
 0x70f   : > { %4572 = vmatprep.subr.mxu0 %v5144_v1 }
 0x710   : > { %v4949_v19 = vpop.eup %4948 }
 0x711   : > { %v4951_v20 = vpop.eup %4950  ;;  %v1593_v22 = vmul.f32 %v4949_v19, %v4941_v5  ;;  %v2336_v19 = vld [vmem:[%s6004_s15 + $0x20] sm:$0xff] }
 0x712   : > { %v1592_v23 = vmul.f32 %v4951_v20, %v4943_v6  ;;  %v2337_v20 = vld [vmem:[%s6004_s15 + $0x28] sm:$0xff] }
 0x713   : > { %4565 = vmatmul.mubr.msk.f32.vlgmr.msra.gmra.mrb[12].mxu0 %vm783_vm2, %v1593_v22  ;;  %v4799_v22 = vpack.c.bf16 %v2337_v20, %v2336_v19  ;;  %v4298_v19 = vld [vmem:[%s5996_s7 + $0xf8] sm:$0xff] }
 0x714   : > { %4560 = vmatmul.mubr.msk.f32.vlgmr.msra.gmra.mrb[10].mxu1 %vm783_vm2, %v1592_v23  ;;  %4574 = vmatprep.mubr.msk.f32.mxu0 %vm5145_vm3, %v5144_v1  ;;  %v2338_v23 = vld [vmem:[%s6004_s15 + $0x30] sm:$0xff] }
 0x715   : > { %4569 = vmatprep.mubr.msk.f32.mxu1 %vm5145_vm3, %v5144_v1  ;;  %4568 = vmatpush3.msra.mxu1 %v1898_v24  ;;  %v2339_v24 = vld [vmem:[%s6004_s15 + $0x38] sm:$0xff] }
 0x716   : > { %4573 = vmatpush3.msra.mxu0 %v1899_v25  ;;  %4577 = vmatprep.subr.mxu1 %v5144_v1  ;;  %v4802_v25 = vpack.c.bf16 %v2339_v24, %v2338_v23 }
 0x717   : > { %4582 = vmatprep.subr.mxu0 %v5144_v1 }
 0x7de   : > { %v1742_v27 = vpop.f32.mrb[10].mxu0 }
 0x7df   : > { %v1666_v29 = vpop.f32.mrb[8].mxu1  ;;  %v4556_v30 = vpop.f32.mrb[11].mxu0  ;;  %4575 = vmatmul.mubr.msk.f32.vlgmr.msra.gmra.mrb[14].mxu0 %vm783_vm2, %v1742_v27 }
 0x7e0   : > { %v4551_v31 = vpop.f32.mrb[9].mxu1  ;;  %4570 = vmatmul.mubr.msk.f32.vlgmr.msra.gmra.mrb[12].mxu1 %vm783_vm2, %v1666_v29  ;;  %4583 = vmatpush3.msra.mxu0 %v1901_v26  ;;  %v4277_v26 = vld [vmem:[%s6003_s14] ss:$0 sm:$0xff] }
 0x7e1   : > { %4578 = vmatpush3.msra.mxu1 %v1900_v28  ;;  %4579 = vmatprep.mubr.msk.f32.mxu1 %vm5145_vm3, %v5144_v1 }
 0x7e2   : > { %4584 = vmatprep.mubr.msk.f32.mxu0 %vm5145_vm3, %v5144_v1  ;;  %4786 = vmatprep.subr.bf16.mxu1 %v5146_v40 }
 0x7e3   : > { %4792 = vmatprep.subr.bf16.mxu0 %v5146_v40 }
 0x7e6   : > { %v1894_v33 = vpop.f32.mrb[12].mxu0 }
 0x7e7   : > { %v1818_v34 = vpop.f32.mrb[10].mxu1  ;;  %v4566_v35 = vpop.f32.mrb[13].mxu0  ;;  %4585 = vmatmul.mubr.msk.f32.vlgmr.msra.gmra.mrb[16].mxu0 %vm783_vm2, %v1894_v33 }
 0x7e8   : > { %v4561_v36 = vpop.f32.mrb[11].mxu1  ;;  %4580 = vmatmul.mubr.msk.f32.vlgmr.msra.gmra.mrb[14].mxu1 %vm783_vm2, %v1818_v34  ;;  %4614 = vmatprep.mubr.msk.f32.mxu0 %vm5145_vm3, %v5144_v1 }
 0x7e9   : > { %4595 = vmatprep.mubr.msk.f32.mxu1 %vm5145_vm3, %v5144_v1  ;;  %4788 = vmatpush3.bf16.msra.mxu1 %v4787_v0 }
 0x7ea   : > { %4789 = vmatprep.subr.bf16.mxu1 %v5146_v40  ;;  %4794 = vmatpush3.bf16.msra.mxu0 %v4793_v16  ;;  %v4295_v16 = vld [vmem:[%s5996_s7 + $0xe0] sm:$0xff] }
 0x7eb   : > { %4795 = vmatprep.subr.bf16.mxu0 %v5146_v40  ;;  %v4823_v18 = vpack.c.bf16 %v4296_v17, %v4295_v16 }
 0x7ed   : > { %4791 = vmatpush3.bf16.msra.mxu1 %v4790_v4 }
 0x7ee   : > { %4804 = vmatprep.subr.bf16.mxu1 %v5146_v40  ;;  %4797 = vmatpush3.bf16.msra.mxu0 %v4796_v21  ;;  %v4297_v21 = vld [vmem:[%s5996_s7 + $0xf0] sm:$0xff] }
 0x7ef   : > { %4798 = vmatprep.subr.bf16.mxu0 %v5146_v40  ;;  %v4826_v20 = vpack.c.bf16 %v4298_v19, %v4297_v21 }
 0x7f2   : > { %4800 = vmatpush3.bf16.msra.mxu0 %v4799_v22  ;;  %v4303_v22 = vld [vmem:[%s5997_s8 + $0x4] ss:$0 sm:$0xff] }
 0x7f3   : > { %4801 = vmatprep.subr.bf16.mxu0 %v5146_v40 }
 0x7f6   : > { %4803 = vmatpush3.bf16.msra.mxu0 %v4802_v25 }
 0x7f7   : > { %4816 = vmatprep.subr.bf16.mxu0 %v5146_v40 }
 0x8b2   : > { %v2044_v37 = vpop.f32.mrb[14].mxu0 }
 0x8b3   : > { %v1971_v38 = vpop.f32.mrb[12].mxu1  ;;  %v2195_v39 = vsel %vm876_vm4, %v2044_v37, 0.0  ;;  %v4576_v41 = vpop.f32.mrb[15].mxu0 }
 0x8b4   : > { %v2194_v42 = vsel %vm876_vm4, %v1971_v38, 0.0  ;;  %v4571_v43 = vpop.f32.mrb[13].mxu1  ;;  %v4279_v41 = vld [vmem:[%s6005_s16] ss:$0 sm:$0xff] }
 0x8b5   : > { %v2196_v11 = vadd.f32 %v2195_v39, %v2194_v42 }
 0x8ba   : > { %v2190_v44 = vpop.f32.mrb[16].mxu0 }
 0x8bb   : > { %v2117_v45 = vpop.f32.mrb[14].mxu1  ;;  %v4586_v46 = vpop.f32.mrb[17].mxu0  ;;  %v2199_v50 = vsel %vm876_vm4, %v2190_v44, 0.0 }
 0x8bc   : > { %v2197_v47 = vsel %vm876_vm4, %v2117_v45, 0.0  ;;  %v4581_v48 = vpop.f32.mrb[15].mxu1 }
 0x8bd   : > { %v2198_v49 = vadd.f32 %v2197_v47, %v2196_v11 }
 0x8bf   : > { %v2200_v52 = vadd.f32 %v2199_v50, %v2198_v49 }
 0x8c1   : > { %v2208_v53 = vadd.f32 %v4274_v51, %v2200_v52  ;;  %v4283_v51 = vld [vmem:[%s5996_s7 + $0x80] sm:$0xff]  ;;  %v4284_v52 = vld [vmem:[%s5996_s7 + $0x88] sm:$0xff] }
 0x8c3   : > { %v2209_v54 = vadd.f32 %v2208_v53, %v5507_v63  ;;  %v4805_v53 = vpack.c.bf16 %v4284_v52, %v4283_v51 }
 0x8c5   : > { %v2212_v55 = vsel %vm876_vm4, %v2209_v54, 0.0 }
 0x8c6   : > { %2213 = vadd.xlane.f32.xlu1 %v2212_v55  ;;  %v4292_v55 = vld [vmem:[%s5996_s7 + $0xc8] sm:$0xff] }
 0x953   : > { %v2214_v56 = vpop.xlane.xlu1 %2213 }
 0x954   : > { %v2215_v57 = vmul.f32 0.03125, %v2214_v56 }
 0x956   : > { %v2216_v58 = vsub.f32 %v2209_v54, %v2215_v57  ;;  %v4291_v54 = vld [vmem:[%s5996_s7 + $0xc0] sm:$0xff]  ;;  %v4285_v57 = vld [vmem:[%s5996_s7 + $0x90] sm:$0xff] }
 0x957   : > { %v4817_v56 = vpack.c.bf16 %v4292_v55, %v4291_v54 }
 0x958   : > { %v2217_v59 = vmul.f32 %v2216_v58, %v2216_v58 }
 0x95a   : > { %v2218_v60 = vsel %vm876_vm4, %v2217_v59, 0.0 }
 0x95b   : > { %2219 = vadd.xlane.f32.xlu0 %v2218_v60  ;;  %v4293_v60 = vld [vmem:[%s5996_s7 + $0xd0] sm:$0xff] }
 0x95c   : > { %v4820_v62 = vpack.c.bf16 %v4294_v61, %v4293_v60 }
 0x9e8   : > { %v2220_v63 = vpop.xlane.xlu0 %2219 }
 0x9e9   : > { %v2221_v5 = vmul.f32 0.03125, %v2220_v63  ;;  %v4281_v63 = vld [vmem:[%s6006_s17] ss:$0 sm:$0xff] }
 0x9eb   : > { %v2222_v6 = vadd.f32 1e-05, %v2221_v5 }
 0x9ed   : > { %4952 = vrsqrt.f32 %v2222_v6  ;;  %v4287_v6 = vld [vmem:[%s5996_s7 + $0xa0] sm:$0xff] }
 0x9f7   : > { %v4953_v7 = vpop.eup %4952 }
 0x9f8   : > { %v2224_v9 = vmul.f32 %v4953_v7, %v2216_v58  ;;  %v4286_v58 = vld [vmem:[%s5996_s7 + $0x98] sm:$0xff]  ;;  %v4288_v7 = vld [vmem:[%s5996_s7 + $0xa8] sm:$0xff] }
 0x9f9   : > { %v4808_v59 = vpack.c.bf16 %v4286_v58, %v4285_v57 }
 0x9fa   : > { %v2231_v12 = vmul.f32 %v4275_v8, %v2224_v9  ;;  %v4282_v8 = vld [vmem:[%s6058_s25] ss:$0 sm:$0xff]  ;;  %s6063_s25 = sld [smem:[#allocation28_spill]] }
 0x9fc   : > { %v2238_v13 = vadd.f32 %v4276_v10, %v2231_v12  ;;  %v4811_v10 = vpack.c.bf16 %v4288_v7, %v4287_v6 }
 0x9fe   : > { %4596 = vmatmul.mubr.msk.f32.vlgmr.msra.gmra.mrb[16].mxu1 %vm876_vm4, %v2238_v13 }
 0x9ff   : > { %4625 = vmatprep.mubr.msk.f32.mxu1 %vm5145_vm3, %v5144_v1  ;;  %4806 = vmatpush3.bf16.msra.mxu1 %v4805_v53 }
 0xa00   : > { %4807 = vmatprep.subr.bf16.mxu1 %v5146_v40  ;;  %s6064_s22 = smov %s6063_s25  ;;  %s5947_s1 = scalar_lea.hbm %s6063_s25, %s4352_s23 }
 0xa03   : > { %4809 = vmatpush3.bf16.msra.mxu1 %v4808_v59 }
 0xa04   : > { %4810 = vmatprep.subr.bf16.mxu1 %v5146_v40 }
 0xad1   : > { %v2319_v27 = vpop.f32.mrb[16].mxu1 }
 0xad2   : > { %v2320_v28 = vadd.f32 %v4277_v26, %v2319_v27  ;;  %v4597_v29 = vpop.f32.mrb[17].mxu1 }
 0xad4   : > { %v2324_v30 = vmul.f32 0.044715, %v2320_v28  ;;  %v2323_v37 = vmul.f32 0.5, %v2320_v28 }
 0xad6   : > { %v2325_v31 = vmul.f32 %v2324_v30, %v2320_v28 }
 0xad8   : > { %v2326_v33 = vmul.f32 %v2325_v31, %v2320_v28 }
 0xada   : > { %v2327_v34 = vadd.f32 %v2326_v33, %v2320_v28  ;;  %v4304_v28 = vld [vmem:[%s5997_s8 + $0x5] ss:$0 sm:$0xff]  ;;  %v4305_v33 = vld [vmem:[%s5997_s8 + $0x6] ss:$0 sm:$0xff] }
 0xadc   : > { %v2328_v35 = vmul.f32 0.7978846, %v2327_v34 }
 0xade   : > { %4954 = vtanh.f32 %v2328_v35  ;;  %v4306_v35 = vld [vmem:[%s5997_s8 + $0x7] ss:$0 sm:$0xff] }
 0xae8   : > { %v4955_v36 = vpop.eup %4954 }
 0xae9   : > { %v2330_v38 = vadd.f32 1.0, %v4955_v36 }
 0xaeb   : > { %v2331_v39 = vmul.f32 %v2330_v38, %v2323_v37 }
 0xaed   : > { %4615 = vmatmul.mubr.msk.f32.vlgmr.msra.gmra.mrb[18].mxu0 %vm2347_vm5, %v2331_v39 }
 0xaee   : > { %4647 = vmatprep.mubr.msk.f32.mxu0 %vm5145_vm3, %v5144_v1  ;;  %4818 = vmatpush3.bf16.msra.mxu0 %v4817_v56 }
 0xaef   : > { %4819 = vmatprep.subr.bf16.mxu0 %v5146_v40 }
 0xaf2   : > { %4821 = vmatpush3.bf16.msra.mxu0 %v4820_v62 }
 0xaf3   : > { %4661 = vmatprep.subr.mxu0 %v5144_v1 }
 0xbc0   : > { %v2417_v42 = vpop.f32.mrb[18].mxu0 }
 0xbc1   : > { %v2418_v43 = vadd.f32 %v4279_v41, %v2417_v42  ;;  %v4616_v11 = vpop.f32.mrb[19].mxu0 }
 0xbc3   : > { %v2421_v44 = vadd.f32 %v2418_v43, %v2238_v13  ;;  %v4289_v13 = vld [vmem:[%s5996_s7 + $0xb0] sm:$0xff] }
 0xbc4   : > { %v4814_v15 = vpack.c.bf16 %v4290_v14, %v4289_v13 }
 0xbc5   : > { %v2424_v45 = vsel %vm876_vm4, %v2421_v44, 0.0 }
 0xbc6   : > { %2425 = vadd.xlane.f32.xlu0 %v2424_v45 }
 0xc53   : > { %v2426_v46 = vpop.xlane.xlu0 %2425 }
 0xc54   : > { %v2427_v47 = vmul.f32 0.03125, %v2426_v46 }
 0xc56   : > { %v2428_v48 = vsub.f32 %v2421_v44, %v2427_v47 }
 0xc58   : > { %v2429_v49 = vmul.f32 %v2428_v48, %v2428_v48 }
 0xc5a   : > { %v2430_v50 = vsel %vm876_vm4, %v2429_v49, 0.0 }
 0xc5b   : > { %2431 = vadd.xlane.f32.xlu1 %v2430_v50 }
 0xce8   : > { %v2432_v0 = vpop.xlane.xlu1 %2431 }
 0xce9   : > { %v2433_v2 = vmul.f32 0.03125, %v2432_v0 }
 0xceb   : > { %v2434_v3 = vadd.f32 1e-05, %v2433_v2 }
 0xced   : > { %4956 = vrsqrt.f32 %v2434_v3 }
 0xcf7   : > { %v4957_v4 = vpop.eup %4956 }
 0xcf8   : > { %v2436_v5 = vmul.f32 %v4957_v4, %v2428_v48 }
 0xcfa   : > { %v2443_v9 = vmul.f32 %v4281_v63, %v2436_v5 }
 0xcfc   : > { %v5740_v12 = vadd.f32 %v4282_v8, %v2443_v9 }
 0xcfe   : > { %4626 = vmatmul.mubr.msk.f32.vlgmr.msra.gmra.mrb[18].mxu1 %vm876_vm4, %v5740_v12  ;;  %4648 = vmatmul.mubr.msk.f32.vlgmr.msra.gmra.mrb[20].mxu0 %vm876_vm4, %v5740_v12 }
 0xcff   : > { %4812 = vmatpush3.bf16.msra.mxu1 %v4811_v10  ;;  %4636 = vmatprep.mubr.msk.f32.mxu1 %vm5145_vm3, %v5144_v1 }
 0xd00   : > { %4813 = vmatprep.subr.bf16.mxu1 %v5146_v40  ;;  %4663 = vmatprep.mubr.msk.f32.mxu0 %vm5145_vm3, %v5144_v1 }
 0xd03   : > { %4815 = vmatpush3.bf16.msra.mxu1 %v4814_v15 }
 0xd04   : > { %4822 = vmatprep.subr.bf16.mxu1 %v5146_v40 }
 0xd06   : > { %4637 = vmatmul.mubr.msk.f32.vlgmr.msra.gmra.mrb[20].mxu1 %vm876_vm4, %v5740_v12 }
 0xd07   : > { %4824 = vmatpush3.bf16.msra.mxu1 %v4823_v18  ;;  %4658 = vmatprep.mubr.msk.f32.mxu1 %vm5145_vm3, %v5144_v1 }
 0xd08   : > { %4825 = vmatprep.subr.bf16.mxu1 %v5146_v40 }
 0xd0b   : > { %4827 = vmatpush3.bf16.msra.mxu1 %v4826_v20 }
 0xd0c   : > { %4671 = vmatprep.subr.mxu1 %v5144_v1 }
 0xd0e   : > { %4659 = vmatmul.mubr.msk.f32.vlgmr.msra.gmra.mrb[22].mxu1 %vm876_vm4, %v5740_v12 }
 0xd0f   : > { %4673 = vmatprep.mubr.msk.f32.mxu1 %vm5145_vm3, %v5144_v1 }
 0xdd1   : > { %v2566_v23 = vpop.f32.mrb[18].mxu1  ;;  %v2706_v24 = vpop.f32.mrb[20].mxu0 }
 0xdd2   : > { %v2567_v25 = vadd.f32 %v4303_v22, %v2566_v23  ;;  %v4627_v26 = vpop.f32.mrb[19].mxu1  ;;  %v4649_v27 = vpop.f32.mrb[21].mxu0  ;;  %v5791_v34 = vadd.f32 %v4305_v33, %v2706_v24 }
 0xdd4   : > { %2785 = vrot.lane.b32.xlu0 %v2567_v25, %s5147_s30  ;;  %v2780_v41 = vmul.f32 0.35355338, %v2567_v25  ;;  %v2782_v44 = vmul.f32 0.35355338, %v5791_v34 }
 0xdd9   : > { %v2636_v29 = vpop.f32.mrb[20].mxu1 }
 0xdda   : > { %v2637_v30 = vadd.f32 %v4304_v28, %v2636_v29  ;;  %v4638_v31 = vpop.f32.mrb[21].mxu1 }
 0xddc   : > { %2863 = vrot.lane.b32.xlu1 %v2637_v30, %s5147_s30  ;;  %v2781_v43 = vmul.f32 0.35355338, %v2637_v30 }
 0xde0   : > { %2941 = vrot.lane.b32.xlu1 %v5791_v34, %s5147_s30 }
 0xde1   : > { %v2776_v36 = vpop.f32.mrb[22].mxu1 }
 0xde2   : > { %v5798_v37 = vadd.f32 %v4306_v35, %v2776_v36  ;;  %v4660_v38 = vpop.f32.mrb[23].mxu1 }
 0xde3   : > { %v3445_v38 = vld [vmem:[#allocation2 + $0x20] sm:$0xff] }
 0xde4   : > { %3019 = vrot.lane.b32.xlu0 %v5798_v37, %s5147_s30  ;;  %v2783_v46 = vmul.f32 0.35355338, %v5798_v37 }
 0xe46   : > { %v2786_v39 = vpop.permute.xlu0 %2785 }
 0xe47   : > { %4662 = vmatpush3.xpose.msk.msra.mxu0 %vm783_vm2, %v2786_v39  ;;  %v3446_v39 = vld [vmem:[#allocation2 + $0x28] sm:$0xff] }
 0xe48   : > { %4666 = vmatprep.subr.mxu0 %v5144_v1 }
 0xe4a   : > { %4664 = vmatmul.mubr.msk.f32.vlgmr.msra.gmra.mrb[22].mxu0 %vm783_vm2, %v2780_v41  ;;  %v3447_v41 = vld [vmem:[#allocation2 + $0x30] sm:$0xff] }
 0xe4b   : > { %4668 = vmatprep.mubr.msk.f32.mxu0 %vm5145_vm3, %v5144_v1 }
 0xe4e   : > { %v2864_v42 = vpop.permute.xlu1 %2863 }
 0xe4f   : > { %4667 = vmatpush3.xpose.msk.msra.mxu0 %vm783_vm2, %v2864_v42 }
 0xe50   : > { %4676 = vmatprep.subr.mxu0 %v5144_v1 }
 0xe52   : > { %v2942_v11 = vpop.permute.xlu1 %2941  ;;  %4669 = vmatmul.mubr.msk.f32.vlgmr.msra.gmra.mrb[24].mxu0 %vm783_vm2, %v2781_v43 }
 0xe53   : > { %4672 = vmatpush3.xpose.msk.msra.mxu1 %vm783_vm2, %v2942_v11  ;;  %4678 = vmatprep.mubr.msk.f32.mxu0 %vm5145_vm3, %v5144_v1  ;;  %v3448_v11 = vld [vmem:[#allocation2 + $0x38] sm:$0xff] }
 0xe54   : > { %4681 = vmatprep.subr.mxu1 %v5144_v1 }
 0xe56   : > { %4674 = vmatmul.mubr.msk.f32.vlgmr.msra.gmra.mrb[24].mxu1 %vm783_vm2, %v2782_v44  ;;  %v3020_v45 = vpop.permute.xlu0 %3019 }
 0xe57   : > { %4677 = vmatpush3.xpose.msk.msra.mxu0 %vm783_vm2, %v3020_v45  ;;  %4683 = vmatprep.mubr.msk.f32.mxu1 %vm5145_vm3, %v5144_v1 }
 0xe58   : > { %4686 = vmatprep.subr.mxu0 %v5144_v1 }
 0xe5a   : > { %4679 = vmatmul.mubr.msk.f32.vlgmr.msra.gmra.mrb[26].mxu0 %vm783_vm2, %v2783_v46 }
 0xe5b   : > { %4688 = vmatprep.mubr.msk.f32.mxu0 %vm5145_vm3, %v5144_v1 }
 0xf1d   : > { %v2858_v47 = vpop.f32.mrb[22].mxu0 }
 0xf1e   : > { %v2859_v48 = vadd.f32 %v2858_v47, %v5587_v32  ;;  %v4665_v49 = vpop.f32.mrb[23].mxu0 }
 0xf20   : > { %v3096_v50 = vsel %vm783_vm2, %v2859_v48, -inf }
 0xf21   : > { %3097 = vmax.xlane.f32.xlu1 %v3096_v50 }
 0xf25   : > { %v2936_v51 = vpop.f32.mrb[24].mxu0 }
 0xf26   : > { %v2937_v52 = vadd.f32 %v2936_v51, %v5587_v32  ;;  %v4670_v53 = vpop.f32.mrb[25].mxu0 }
 0xf28   : > { %v3099_v54 = vsel %vm783_vm2, %v2937_v52, -inf }
 0xf29   : > { %3100 = vmax.xlane.f32.xlu0 %v3099_v54  ;;  %v3014_v55 = vpop.f32.mrb[24].mxu1 }
 0xf2a   : > { %v3015_v56 = vadd.f32 %v3014_v55, %v5587_v32  ;;  %v4675_v57 = vpop.f32.mrb[25].mxu1 }
 0xf2c   : > { %v3102_v58 = vsel %vm783_vm2, %v3015_v56, -inf }
 0xf2d   : > { %v3092_v59 = vpop.f32.mrb[26].mxu0  ;;  %3103 = vmax.xlane.f32.xlu0 %v3102_v58 }
 0xf2e   : > { %v3093_v60 = vadd.f32 %v3092_v59, %v5587_v32  ;;  %v4680_v61 = vpop.f32.mrb[27].mxu0 }
 0xf30   : > { %v3105_v62 = vsel %vm783_vm2, %v3093_v60, -inf }
 0xf31   : > { %3106 = vmax.xlane.f32.xlu1 %v3105_v62 }
 0xf42   : > { %3216 = vrot.lane.b32.xlu1 %v2637_v30, %s5148_s21 }
 0xf43   : > { %3140 = vrot.lane.b32.xlu0 %v2567_v25, %s5148_s21 }
 0xfae   : > { %v3098_v0 = vpop.xlane.xlu1 %3097 }
 0xfaf   : > { %v3108_v2 = vsub.f32 %v2859_v48, %v3098_v0  ;;  %v4328_v0 = vld [vmem:[%s5999_s10 + $0x1] ss:$0 sm:$0xff] }
 0xfb1   : > { %v3112_v3 = vmul.f32 1.442695, %v3108_v2 }
 0xfb3   : > { %4958 = vpow2.f32 %v3112_v3 }
 0xfb6   : > { %v3101_v4 = vpop.xlane.xlu0 %3100 }
 0xfb7   : > { %v3109_v63 = vsub.f32 %v2937_v52, %v3101_v4 }
 0xfb9   : > { %v3114_v5 = vmul.f32 1.442695, %v3109_v63 }
 0xfba   : > { %v3104_v6 = vpop.xlane.xlu0 %3103 }
 0xfbb   : > { %4960 = vpow2.f32 %v3114_v5  ;;  %v3110_v7 = vsub.f32 %v3015_v56, %v3104_v6 }
 0xfbd   : > { %v4959_v8 = vpop.eup %4958  ;;  %v3116_v32 = vmul.f32 1.442695, %v3110_v7 }
 0xfbe   : > { %v3107_v9 = vpop.xlane.xlu1 %3106  ;;  %v3141_v10 = vpop.permute.xlu0 %3140  ;;  %v3120_v13 = vsel %vm783_vm2, %v4959_v8, 0.0 }
 0xfbf   : > { %4962 = vpow2.f32 %v3116_v32  ;;  %v3111_v14 = vsub.f32 %v3093_v60, %v3107_v9  ;;  %4682 = vmatpush3.msra.mxu1 %v3141_v10  ;;  %3121 = vadd.xlane.f32.xlu0 %v3120_v13  ;;  %v3790_v10 = vld [vmem:[#allocation5 + $0x20] sm:$0xff]  ;;  %v3791_v13 = vld [vmem:[#allocation5 + $0x28] sm:$0xff] }
 0xfc0   : > { %4691 = vmatprep.subr.mxu1 %v5144_v1 }
 0xfc1   : > { %v3118_v15 = vmul.f32 1.442695, %v3111_v14  ;;  %v4829_v14 = vpack.c.bf16 %v3791_v13, %v3790_v10 }
 0xfc2   : > { %v3217_v16 = vpop.permute.xlu1 %3216 }
 0xfc3   : > { %4964 = vpow2.f32 %v3118_v15  ;;  %4687 = vmatpush3.msra.mxu0 %v3217_v16  ;;  %v3792_v15 = vld [vmem:[#allocation5 + $0x30] sm:$0xff]  ;;  %v3793_v16 = vld [vmem:[#allocation5 + $0x38] sm:$0xff] }
 0xfc4   : > { %4696 = vmatprep.subr.mxu0 %v5144_v1 }
 0xfc5   : > { %v4961_v17 = vpop.eup %4960 }
 0xfc6   : > { %v3123_v18 = vsel %vm783_vm2, %v4961_v17, 0.0 }
 0xfc7   : > { %3124 = vadd.xlane.f32.xlu1 %v3123_v18 }
 0xfc9   : > { %v4963_v21 = vpop.eup %4962 }
 0xfca   : > { %v3126_v19 = vsel %vm783_vm2, %v4963_v21, 0.0 }
 0xfcb   : > { %3127 = vadd.xlane.f32.xlu0 %v3126_v19 }
 0xfcd   : > { %v4965_v20 = vpop.eup %4964 }
 0xfce   : > { %v3129_v22 = vsel %vm783_vm2, %v4965_v20, 0.0 }
 0xfcf   : > { %3130 = vadd.xlane.f32.xlu1 %v3129_v22 }
 0xfe0   : > { %3292 = vrot.lane.b32.xlu1 %v5791_v34, %s5148_s21 }
 0xfe1   : > { %3368 = vrot.lane.b32.xlu0 %v5798_v37, %s5148_s21  ;;  %s6061_s21 = sld [smem:[#allocation27_spill]] }
0x104c   : > { %v3122_v23 = vpop.xlane.xlu0 %3121 }
0x104d   : > { %4966 = vrcp.f32 %v3122_v23  ;;  %v4332_v23 = vld [vmem:[%s6001_s12 + $0x1] ss:$0 sm:$0xff] }
0x1054   : > { %v3125_v24 = vpop.xlane.xlu1 %3124 }
0x1055   : > { %4968 = vrcp.f32 %v3125_v24 }
0x1057   : > { %v4967_v25 = vpop.eup %4966 }
0x1058   : > { %v3136_v26 = vmul.f32 %v4967_v25, %v4959_v8  ;;  %v3128_v27 = vpop.xlane.xlu0 %3127 }
0x1059   : > { %4970 = vrcp.f32 %v3128_v27  ;;  %v4337_v27 = vld [vmem:[%s6004_s15 + $0x48] sm:$0xff] }
0x105a   : > { %4684 = vmatmul.mubr.msk.f32.vlgmr.msra.gmra.mrb[26].mxu1 %vm783_vm2, %v3136_v26  ;;  %v4336_v26 = vld [vmem:[%s6004_s15 + $0x40] sm:$0xff] }
0x105b   : > { %4693 = vmatprep.mubr.msk.f32.mxu1 %vm5145_vm3, %v5144_v1 }
0x105c   : > { %v3131_v28 = vpop.xlane.xlu1 %3130  ;;  %v3369_v33 = vpop.permute.xlu0 %3368 }
0x105d   : > { %4972 = vrcp.f32 %v3131_v28  ;;  %v4835_v28 = vpack.c.bf16 %v4337_v27, %v4336_v26 }
0x105f   : > { %v4969_v29 = vpop.eup %4968 }
0x1060   : > { %v3137_v30 = vmul.f32 %v4969_v29, %v4961_v17  ;;  %v3293_v31 = vpop.permute.xlu1 %3292  ;;  %v4832_v17 = vpack.c.bf16 %v3793_v16, %v3792_v15  ;;  %v4338_v29 = vld [vmem:[%s6004_s15 + $0x50] sm:$0xff] }
0x1061   : > { %4692 = vmatpush3.msra.mxu1 %v3293_v31 }
0x1062   : > { %4689 = vmatmul.mubr.msk.f32.vlgmr.msra.gmra.mrb[28].mxu0 %vm783_vm2, %v3137_v30  ;;  %4701 = vmatprep.subr.mxu1 %v5144_v1  ;;  %v4339_v30 = vld [vmem:[%s6004_s15 + $0x58] sm:$0xff] }
0x1063   : > { %v4971_v34 = vpop.eup %4970  ;;  %4697 = vmatpush3.msra.mxu0 %v3369_v33  ;;  %4698 = vmatprep.mubr.msk.f32.mxu0 %vm5145_vm3, %v5144_v1  ;;  %v4838_v31 = vpack.c.bf16 %v4339_v30, %v4338_v29  ;;  %v4341_v33 = vld [vmem:[%s6004_s15 + $0x68] sm:$0xff] }
0x1064   : > { %v3138_v35 = vmul.f32 %v4971_v34, %v4963_v21  ;;  %4706 = vmatprep.subr.mxu0 %v5144_v1 }
0x1066   : > { %4694 = vmatmul.mubr.msk.f32.vlgmr.msra.gmra.mrb[28].mxu1 %vm783_vm2, %v3138_v35  ;;  %v4342_v35 = vld [vmem:[%s6004_s15 + $0x70] sm:$0xff] }
0x1067   : > { %v4973_v36 = vpop.eup %4972  ;;  %4703 = vmatprep.mubr.msk.f32.mxu1 %vm5145_vm3, %v5144_v1  ;;  %4702 = vmatpush3.msra.mxu1 %v3445_v38  ;;  %v4334_v38 = vld [vmem:[%s6003_s14 + $0x1] ss:$0 sm:$0xff] }
0x1068   : > { %v3139_v37 = vmul.f32 %v4973_v36, %v4965_v20  ;;  %4711 = vmatprep.subr.mxu1 %v5144_v1  ;;  %v4331_v20 = vld [vmem:[%s6000_s11 + $0x1] ss:$0 sm:$0xff]  ;;  %v4343_v36 = vld [vmem:[%s6004_s15 + $0x78] sm:$0xff] }
0x106a   : > { %4699 = vmatmul.mubr.msk.f32.vlgmr.msra.gmra.mrb[30].mxu0 %vm783_vm2, %v3139_v37  ;;  %v4844_v37 = vpack.c.bf16 %v4343_v36, %v4342_v35 }
0x106b   : > { %4708 = vmatprep.mubr.msk.f32.mxu0 %vm5145_vm3, %v5144_v1  ;;  %4707 = vmatpush3.msra.mxu0 %v3446_v39 }
0x106c   : > { %4716 = vmatprep.subr.mxu0 %v5144_v1 }
0x112d   : > { %v3212_v42 = vpop.f32.mrb[26].mxu1 }
0x112e   : > { %v4685_v43 = vpop.f32.mrb[27].mxu1  ;;  %4704 = vmatmul.mubr.msk.f32.vlgmr.msra.gmra.mrb[30].mxu1 %vm783_vm2, %v3212_v42 }
0x112f   : > { %4712 = vmatpush3.msra.mxu1 %v3447_v41  ;;  %4713 = vmatprep.mubr.msk.f32.mxu1 %vm5145_vm3, %v5144_v1 }
0x1130   : > { %4828 = vmatprep.subr.bf16.mxu1 %v5146_v40 }
0x1135   : > { %v3288_v44 = vpop.f32.mrb[28].mxu0 }
0x1136   : > { %v4690_v45 = vpop.f32.mrb[29].mxu0  ;;  %4709 = vmatmul.mubr.msk.f32.vlgmr.msra.gmra.mrb[32].mxu0 %vm783_vm2, %v3288_v44 }
0x1137   : > { %4717 = vmatpush3.msra.mxu0 %v3448_v11  ;;  %4718 = vmatprep.mubr.msk.f32.mxu0 %vm5145_vm3, %v5144_v1 }
0x1138   : > { %4834 = vmatprep.subr.bf16.mxu0 %v5146_v40 }
0x1139   : > { %v3364_v46 = vpop.f32.mrb[28].mxu1 }
0x113a   : > { %v4695_v47 = vpop.f32.mrb[29].mxu1  ;;  %4714 = vmatmul.mubr.msk.f32.vlgmr.msra.gmra.mrb[32].mxu1 %vm783_vm2, %v3364_v46 }
0x113b   : > { %4729 = vmatprep.mubr.msk.f32.mxu1 %vm5145_vm3, %v5144_v1  ;;  %4830 = vmatpush3.bf16.msra.mxu1 %v4829_v14  ;;  %v4010_v14 = vld [vmem:[%s6061_s21] sm:$0x1] }
0x113c   : > { %4831 = vmatprep.subr.bf16.mxu1 %v5146_v40 }
0x113d   : > { %v3440_v48 = vpop.f32.mrb[30].mxu0 }
0x113e   : > { %v4700_v49 = vpop.f32.mrb[31].mxu0  ;;  %4719 = vmatmul.mubr.msk.f32.vlgmr.msra.gmra.mrb[34].mxu0 %vm783_vm2, %v3440_v48 }
0x113f   : > { %4748 = vmatprep.mubr.msk.f32.mxu0 %vm5145_vm3, %v5144_v1  ;;  %4833 = vmatpush3.bf16.msra.mxu1 %v4832_v17 }
0x1140   : > { %4846 = vmatprep.subr.bf16.mxu1 %v5146_v40  ;;  %4836 = vmatpush3.bf16.msra.mxu0 %v4835_v28 }
0x1141   : > { %4837 = vmatprep.subr.bf16.mxu0 %v5146_v40 }
0x1144   : > { %4839 = vmatpush3.bf16.msra.mxu0 %v4838_v31 }
0x1145   : > { %4840 = vmatprep.subr.bf16.mxu0 %v5146_v40 }
0x1201   : > { %v3518_v50 = vpop.f32.mrb[30].mxu1 }
0x1202   : > { %v4705_v51 = vpop.f32.mrb[31].mxu1  ;;  %v3741_v53 = vsel %vm876_vm4, %v3518_v50, 0.0 }
0x1203   : > { %v4345_v51 = vld [vmem:[%s6005_s16 + $0x1] ss:$0 sm:$0xff] }
0x1209   : > { %v3591_v52 = vpop.f32.mrb[32].mxu0 }
0x120a   : > { %v3742_v54 = vsel %vm876_vm4, %v3591_v52, 0.0  ;;  %v4710_v55 = vpop.f32.mrb[33].mxu0 }
0x120b   : > { %v3743_v56 = vadd.f32 %v3742_v54, %v3741_v53 }
0x120d   : > { %v3664_v57 = vpop.f32.mrb[32].mxu1 }
0x120e   : > { %v3744_v58 = vsel %vm876_vm4, %v3664_v57, 0.0  ;;  %v4715_v59 = vpop.f32.mrb[33].mxu1 }
0x120f   : > { %v3745_v60 = vadd.f32 %v3744_v58, %v3743_v56 }
0x1211   : > { %v3737_v61 = vpop.f32.mrb[34].mxu0 }
0x1212   : > { %v3746_v62 = vsel %vm876_vm4, %v3737_v61, 0.0  ;;  %v4720_v2 = vpop.f32.mrb[35].mxu0 }
0x1213   : > { %v3747_v3 = vadd.f32 %v3746_v62, %v3745_v60  ;;  %v4006_v62 = vld [vmem:[#allocation7] sm:$0xff] }
0x1215   : > { %v3756_v4 = vadd.f32 %v4328_v0, %v3747_v3  ;;  %v4007_v0 = vld [vmem:[#allocation7 + $0x8] sm:$0xff]  ;;  %v4008_v3 = vld [vmem:[#allocation7 + $0x10] sm:$0xff] }
0x1216   : > { %v4847_v2 = vpack.c.bf16 %v4007_v0, %v4006_v62 }
0x1217   : > { %v3757_v63 = vadd.f32 %v3756_v4, %v5740_v12  ;;  %v4009_v4 = vld [vmem:[#allocation7 + $0x18] sm:$0xff] }
0x1219   : > { %v3762_v5 = vsel %vm876_vm4, %v3757_v63, 0.0 }
0x121a   : > { %3763 = vadd.xlane.f32.xlu1 %v3762_v5 }
0x12a7   : > { %v3764_v6 = vpop.xlane.xlu1 %3763 }
0x12a8   : > { %v3765_v7 = vmul.f32 0.03125, %v3764_v6 }
0x12aa   : > { %v3766_v8 = vsub.f32 %v3757_v63, %v3765_v7  ;;  %v4850_v63 = vpack.c.bf16 %v4009_v4, %v4008_v3 }
0x12ac   : > { %v3767_v32 = vmul.f32 %v3766_v8, %v3766_v8 }
0x12ae   : > { %v3768_v9 = vsel %vm876_vm4, %v3767_v32, 0.0  ;;  %v4349_v32 = vld [vmem:[%s6006_s17 + $0x1] ss:$0 sm:$0xff] }
0x12af   : > { %3769 = vadd.xlane.f32.xlu0 %v3768_v9 }
0x133c   : > { %v3770_v12 = vpop.xlane.xlu0 %3769 }
0x133d   : > { %v3771_v18 = vmul.f32 0.03125, %v3770_v12 }
0x133f   : > { %v3772_v21 = vadd.f32 1e-05, %v3771_v18 }
0x1341   : > { %4974 = vrsqrt.f32 %v3772_v21 }
0x134b   : > { %v4975_v19 = vpop.eup %4974 }
0x134c   : > { %v3774_v22 = vmul.f32 %v4975_v19, %v3766_v8 }
0x134e   : > { %v3781_v24 = vmul.f32 %v4331_v20, %v3774_v22 }
0x1350   : > { %v3788_v25 = vadd.f32 %v4332_v23, %v3781_v24 }
0x1352   : > { %4730 = vmatmul.mubr.msk.f32.vlgmr.msra.gmra.mrb[34].mxu1 %vm876_vm4, %v3788_v25 }
0x1353   : > { %4759 = vmatprep.mubr.msk.f32.mxu1 %vm5145_vm3, %v5144_v1  ;;  %v4340_v1 = vld [vmem:[%s6004_s15 + $0x60] sm:$0xff]  ;;  %4848 = vmatpush3.bf16.msra.mxu1 %v4847_v2 }
0x1354   : > { %v4841_v34 = vpack.c.bf16 %v4341_v33, %v4340_v1  ;;  %4849 = vmatprep.subr.bf16.mxu1 %v5146_v40 }
0x1356   : > { %4842 = vmatpush3.bf16.msra.mxu0 %v4841_v34 }
0x1357   : > { %4843 = vmatprep.subr.bf16.mxu0 %v5146_v40  ;;  %4851 = vmatpush3.bf16.msra.mxu1 %v4850_v63  ;;  %v4350_v40 = vld [vmem:[%s6059_s5 + $0x1] ss:$0 sm:$0xff] }
0x135a   : > { %4845 = vmatpush3.bf16.msra.mxu0 %v4844_v37 }
0x1425   : > { %v3871_v39 = vpop.f32.mrb[34].mxu1 }
0x1426   : > { %v3872_v41 = vadd.f32 %v4334_v38, %v3871_v39  ;;  %v4731_v42 = vpop.f32.mrb[35].mxu1 }
0x1428   : > { %v3876_v43 = vmul.f32 0.044715, %v3872_v41  ;;  %v3875_v48 = vmul.f32 0.5, %v3872_v41 }
0x142a   : > { %v3877_v11 = vmul.f32 %v3876_v43, %v3872_v41 }
0x142c   : > { %v3878_v44 = vmul.f32 %v3877_v11, %v3872_v41 }
0x142e   : > { %v3879_v45 = vadd.f32 %v3878_v44, %v3872_v41 }
0x1430   : > { %v3880_v46 = vmul.f32 0.7978846, %v3879_v45 }
0x1432   : > { %4976 = vtanh.f32 %v3880_v46 }
0x143c   : > { %v4977_v47 = vpop.eup %4976 }
0x143d   : > { %v3882_v49 = vadd.f32 1.0, %v4977_v47 }
0x143f   : > { %v3883_v50 = vmul.f32 %v3882_v49, %v3875_v48 }
0x1441   : > { %4749 = vmatmul.mubr.msk.f32.vlgmr.msra.gmra.mrb[36].mxu0 %vm2347_vm5, %v3883_v50 }
0x1514   : > { %v3970_v52 = vpop.f32.mrb[36].mxu0 }
0x1515   : > { %v3971_v53 = vadd.f32 %v4345_v51, %v3970_v52  ;;  %v4750_v54 = vpop.f32.mrb[37].mxu0 }
0x1517   : > { %v3974_v55 = vadd.f32 %v3971_v53, %v3788_v25 }
0x1519   : > { %v3979_v56 = vsel %vm876_vm4, %v3974_v55, 0.0 }
0x151a   : > { %3980 = vadd.xlane.f32.xlu0 %v3979_v56 }
0x15a7   : > { %v3981_v57 = vpop.xlane.xlu0 %3980 }
0x15a8   : > { %v3982_v58 = vmul.f32 0.03125, %v3981_v57 }
0x15aa   : > { %v3983_v59 = vsub.f32 %v3974_v55, %v3982_v58 }
0x15ac   : > { %v3984_v60 = vmul.f32 %v3983_v59, %v3983_v59 }
0x15ae   : > { %v3985_v61 = vsel %vm876_vm4, %v3984_v60, 0.0 }
0x15af   : > { %3986 = vadd.xlane.f32.xlu1 %v3985_v61 }
0x163c   : > { %v3987_v5 = vpop.xlane.xlu1 %3986 }
0x163d   : > { %v3988_v6 = vmul.f32 0.03125, %v3987_v5 }
0x163f   : > { %v3989_v7 = vadd.f32 1e-05, %v3988_v6 }
0x1641   : > { %4978 = vrsqrt.f32 %v3989_v7 }
0x164b   : > { %v4979_v8 = vpop.eup %4978 }
0x164c   : > { %v3991_v9 = vmul.f32 %v4979_v8, %v3983_v59 }
0x164e   : > { %v3998_v10 = vmul.f32 %v4349_v32, %v3991_v9 }
0x1650   : > { %v4005_v13 = vadd.f32 %v4350_v40, %v3998_v10 }
0x1652   : > { %4760 = vmatmul.mubr.msk.f32.vlgmr.msra.gmra.mrb[36].mxu1 %vm876_vm4, %v4005_v13 }
0x1725   : > { %v4080_v15 = vpop.f32.mrb[36].mxu1 }
0x1726   : > { %v4081_v16 = vadd.f32 %v4080_v15, %v4010_v14  ;;  %v4761_v17 = vpop.f32.mrb[37].mxu1 }
0x1728   : > { %4980 = vtanh.f32 %v4081_v16 }
0x1732   : > { %v4981_v12 = vpop.eup %4980 }
0x1733   : > { %4086 = vst.msk [vmem:[%s740_s28] sm:$0x1] %vm4085_vm6, %v4981_v12 }
0x1734   : > { %5079 = shalt.err (!%p5076_p9)
}
0x1735   : > { %s5080_s30 = scalar_lea.hbm %s5947_s1, 16  ;;  %s5084_s23 = scalar_lea.hbm %s6064_s22, 32 }
0x1736   : > { %p5081_p2 = scmp.ne.s32.totalorder %s5947_s1, %s5080_s30  ;;  %p5085_p5 = scmp.lt.u32.totalorder %s5947_s1, %s6064_s22 }
0x1737   : > { %p5086_p10 = scmp.lt.u32.totalorder %s5084_s23, %s5080_s30  ;;  %p5088_p12 = scmp.lt.u32.totalorder %s5080_s30, %s5947_s1 }
0x1738   : > { %p5082_p0 = pnand %p5081_p2, %p6065_p7 }
0x1739   : > { %p5087_p4 = por %p5086_p10, %p5085_p5 }
0x173a   : > { %p5083_p3 = pneg %p5082_p0 }
0x173b   : > { %p5089_p8 = por %p5088_p12, %p5087_p4 }
0x173d   : > { %p5090_p11 = pnand %p5089_p8, %p5083_p3 }
0x173f   : > { %5093 = shalt.err (!%p5090_p11)
}
0x1740   : > { %4864 = dma.vmem_to_hbm [thread:$0]  (%p6065_p7), %s5949_s29, 16, %s5947_s1, %s4088_s0  }
0x1741 PF: > { %s6066_s20 = sld [smem:[#allocation15_spill]]  ;;  %s6067_s25 = sld [smem:[#allocation12_spill]] }
0x1742   : > { %s6068_s27 = sld [smem:[#allocation19_spill]] }
0x1747   : > { %p4886_p13 = scmp.ge.s32.totalorder %s6066_s20, 2  ;;  %s4112_s3 = sand.u32 1, %s6067_s25  }
0x1748   : > { %p6069_p1 = scmp.ne.s32.totalorder %s6068_s27, 0  ;;  %s4113_s26 = scalar_lea.sflag [#allocation4], %s4112_s3 }
0x174a   : > { %p4877_p6 = pnand %p4886_p13, %p6069_p1 }
0x174c   : > { %5119 = dma.done.wait (!%p4877_p6), %s4113_s26, 16  }
0x174d   : > { %5121 = vsyncadd (!%p4877_p6), %s4113_s26, 4294967280  ;;  %s6070_s27 = sld [smem:[#allocation16_spill]]  ;;  %s6071_s2 = sld [smem:[#allocation13_spill]] }
0x174e   : > { %s6072_s25 = sld [smem:[#allocation14_spill]]  ;;  %s6073_s26 = sld [smem:[#allocation17_spill]] }
0x1753   : > { %p33_p9 = scmp.ge.s32.totalorder %s6070_s27, 4  }
0x1755   :  { %35 = sbr.rel (!%p33_p9) target bundleno = 15 (0xf), region = 176 }
0x175c   :  { %4117 = vsyncpa [#allocation3], 1 }
0x175d   :  { %4119 = vsyncpa [#allocation3 + $0x1], 1 }
0x175e   :  { %4120 = vsyncpa [#allocation6], 1 }
0x175f   :  { %4121 = vsyncpa [#allocation4], 1 }
0x1760   :  { %4123 = vsyncpa [#allocation4 + $0x1], 1 }

</bundles_post_ra>
